<compile_context>
chip_gen: v7x
topology: tpu7x:2x2x1
jax: 0.10.0
libtpu: 0.0.40
codegen_flags: <defaults>
</compile_context>

<pallas_src>
import functools

import jax
import jax.numpy as jnp
from jax.experimental import pallas as pl
from jax.experimental.pallas import tpu as pltpu

LN_EPS = 1e-5                     # torch.nn.LayerNorm default
TILE_ROWS = 512                   # row tile (v5e/v6e: ~85% HBM roofline)
VMEM_LIMIT = 48 * 1024 * 1024     # safe on v7x (64 MiB phys) and v5e/v6e


# ----------------------------- in-kernel math helpers -----------------------------

def _layernorm_f32(x, g, b):
    mu = jnp.mean(x, axis=-1, keepdims=True)
    var = jnp.mean(jnp.square(x - mu), axis=-1, keepdims=True)
    return (x - mu) * jax.lax.rsqrt(var + LN_EPS) * g + b


def _erf(x):
    # Abramowitz & Stegun 7.1.26 polynomial (max abs err ~1.5e-7); avoids
    # depending on a lax.erf Mosaic lowering.  exp goes to the EUP slot.
    p = 0.3275911
    a1, a2, a3, a4, a5 = (0.254829592, -0.284496736, 1.421413741,
                          -1.453152027, 1.061405429)
    sign = jnp.where(x >= 0.0, 1.0, -1.0)
    ax = jnp.abs(x)
    t = 1.0 / (1.0 + p * ax)
    poly = ((((a5 * t + a4) * t + a3) * t + a2) * t + a1) * t
    return sign * (1.0 - poly * jnp.exp(-ax * ax))


def _gelu_exact(x):
    return 0.5 * x * (1.0 + _erf(x * 0.7071067811865476))


def _row_tile(rows):
    return rows if rows <= TILE_ROWS else TILE_ROWS


# ----------------------------- generic fused LN/matmul kernel -----------------------------

def tiled_matmul(x2d, w_bf16, *, ln=None, bias=None, ln2=None, gelu=False):
    """out = [LN2?]( [LN1?](x) @ W_bf16 [+ bias] [GELU?] ), row-tiled.

    LN params / bias must already be (1, D)-shaped f32 row vectors; the
    weight must already be bf16 (done once in prepare_params)."""
    R, D = x2d.shape
    N = w_bf16.shape[1]
    tile = _row_tile(R)
    has_ln, has_bias, has_ln2 = ln is not None, bias is not None, ln2 is not None

    inputs = [x2d]
    specs = [pl.BlockSpec((tile, D), lambda i: (i, 0))]
    if has_ln:
        g, b = ln
        inputs += [g, b]
        specs += [pl.BlockSpec((1, D), lambda i: (0, 0)),
                  pl.BlockSpec((1, D), lambda i: (0, 0))]
    inputs.append(w_bf16)
    specs.append(pl.BlockSpec((D, N), lambda i: (0, 0)))
    if has_bias:
        inputs.append(bias)
        specs.append(pl.BlockSpec((1, N), lambda i: (0, 0)))
    if has_ln2:
        g2, b2 = ln2
        inputs += [g2, b2]
        specs += [pl.BlockSpec((1, N), lambda i: (0, 0)),
                  pl.BlockSpec((1, N), lambda i: (0, 0))]

    def kernel(*refs):
        o_ref = refs[-1]
        it = iter(refs[:-1])
        x = next(it)[...].astype(jnp.float32)
        if has_ln:
            x = _layernorm_f32(x, next(it)[...], next(it)[...])
        wv = next(it)[...]                              # already bf16
        y = jnp.dot(x.astype(jnp.bfloat16), wv,
                    preferred_element_type=jnp.float32)
        if has_bias:
            y = y + next(it)[...]
        if gelu:
            y = _gelu_exact(y)
        if has_ln2:
            y = _layernorm_f32(y, next(it)[...], next(it)[...])
        o_ref[...] = y.astype(o_ref.dtype)

    cost = pl.CostEstimate(
        flops=2 * R * D * N,
        transcendentals=(R * N if gelu else 0),
        bytes_accessed=4 * (R * D + R * N) + 2 * D * N)

    return pl.pallas_call(
        kernel,
        out_shape=jax.ShapeDtypeStruct((R, N), x2d.dtype),
        grid=(pl.cdiv(R, tile),),
        in_specs=specs,
        out_specs=pl.BlockSpec((tile, N), lambda i: (i, 0)),
        compiler_params=pltpu.CompilerParams(
            dimension_semantics=("parallel",),
            vmem_limit_bytes=VMEM_LIMIT),
        cost_estimate=cost,
    )(*inputs)


def tiled_layernorm(x2d, g, b):
    """Standalone LN (only needed for the pool='mean' path). g/b are (1, D)."""
    R, D = x2d.shape
    tile = _row_tile(R)

    def kernel(x_ref, g_ref, b_ref, o_ref):
        o_ref[...] = _layernorm_f32(x_ref[...].astype(jnp.float32),
                                    g_ref[...], b_ref[...]).astype(o_ref.dtype)

    return pl.pallas_call(
        kernel,
        out_shape=jax.ShapeDtypeStruct((R, D), x2d.dtype),
        grid=(pl.cdiv(R, tile),),
        in_specs=[pl.BlockSpec((tile, D), lambda i: (i, 0)),
                  pl.BlockSpec((1, D), lambda i: (0, 0)),
                  pl.BlockSpec((1, D), lambda i: (0, 0))],
        out_specs=pl.BlockSpec((tile, D), lambda i: (i, 0)),
        compiler_params=pltpu.CompilerParams(
            dimension_semantics=("parallel",),
            vmem_limit_bytes=VMEM_LIMIT),
    )(x2d, g, b)


# ----------------------------- fused feed-forward block -----------------------------

def ff_block(x2d, g, b, w1, b1, w2, b2):
    """x + Linear(GELU(Linear(LN(x)))) in one row-tiled kernel.

    g/b/b1/b2 are (1, D)/(1, Dh) f32; w1/w2 are bf16."""
    R, D = x2d.shape
    Dh = w1.shape[1]
    tile = _row_tile(R)

    def kernel(x_ref, g_ref, b_ref, w1_ref, b1_ref, w2_ref, b2_ref, o_ref):
        x = x_ref[...].astype(jnp.float32)
        xn = _layernorm_f32(x, g_ref[...], b_ref[...])
        h = jnp.dot(xn.astype(jnp.bfloat16), w1_ref[...],
                    preferred_element_type=jnp.float32) + b1_ref[...]
        h = _gelu_exact(h)                                   # never leaves VMEM
        y = jnp.dot(h.astype(jnp.bfloat16), w2_ref[...],
                    preferred_element_type=jnp.float32) + b2_ref[...]
        o_ref[...] = (y + x).astype(o_ref.dtype)             # fused residual

    cost = pl.CostEstimate(flops=4 * R * D * Dh, transcendentals=R * Dh,
                           bytes_accessed=4 * 2 * R * D + 2 * 2 * D * Dh)

    return pl.pallas_call(
        kernel,
        out_shape=jax.ShapeDtypeStruct((R, D), x2d.dtype),
        grid=(pl.cdiv(R, tile),),
        in_specs=[pl.BlockSpec((tile, D), lambda i: (i, 0)),
                  pl.BlockSpec((1, D), lambda i: (0, 0)),
                  pl.BlockSpec((1, D), lambda i: (0, 0)),
                  pl.BlockSpec((D, Dh), lambda i: (0, 0)),
                  pl.BlockSpec((1, Dh), lambda i: (0, 0)),
                  pl.BlockSpec((Dh, D), lambda i: (0, 0)),
                  pl.BlockSpec((1, D), lambda i: (0, 0))],
        out_specs=pl.BlockSpec((tile, D), lambda i: (i, 0)),
        compiler_params=pltpu.CompilerParams(
            dimension_semantics=("parallel",),
            vmem_limit_bytes=VMEM_LIMIT),
        cost_estimate=cost,
    )(x2d, g, b, w1, b1, w2, b2)


# ----------------------------- fused attention block -----------------------------

def _attn_layer_kernel(x_ref, g_ref, b_ref, wqkv_ref, wo_ref, bo_ref, o_ref,
                       *, heads, dim_head):
    # One batch element per grid step.  Softmax scale is pre-baked into the
    # Q columns of wqkv, so no N^2 scaling multiply is needed here.
    inner = heads * dim_head
    x = x_ref[0].astype(jnp.float32)                               # (N, dim)
    xn = _layernorm_f32(x, g_ref[...], b_ref[...]).astype(jnp.bfloat16)

    # Fused, lane-dense QKV projection: (N, dim) @ (dim, 3*inner).
    qkv = jnp.dot(xn, wqkv_ref[...], preferred_element_type=jnp.float32)

    heads_out = []
    for h in range(heads):                                         # static unroll
        lo = h * dim_head
        q = qkv[:, lo:lo + dim_head].astype(jnp.bfloat16)
        k = qkv[:, inner + lo:inner + lo + dim_head].astype(jnp.bfloat16)
        v = qkv[:, 2 * inner + lo:2 * inner + lo + dim_head].astype(jnp.bfloat16)
        s = jax.lax.dot_general(q, k, (((1,), (1,)), ((), ())),
                                preferred_element_type=jnp.float32)  # (N, N)
        s = s - jnp.max(s, axis=-1, keepdims=True)
        p = jnp.exp(s)
        p = p * pl.reciprocal(jnp.sum(p, axis=-1, keepdims=True), approx=True)
        heads_out.append(jnp.dot(p.astype(jnp.bfloat16), v,
                                 preferred_element_type=jnp.float32))  # (N, dh)

    attn = jnp.concatenate(heads_out, axis=-1).astype(jnp.bfloat16)    # (N, inner)
    # Fused output projection: (N, inner) @ (inner, dim).
    y = jnp.dot(attn, wo_ref[...], preferred_element_type=jnp.float32)
    o_ref[0] = (x + y + bo_ref[...]).astype(o_ref.dtype)               # residual


def attention_block(x, g, b, w_qkv, w_out, b_out, *, heads, dim_head):
    """x + to_out(attn(LN(x))) — one fused kernel per layer, gridded over B.

    g/b/b_out are (1, dim) f32; w_qkv (dim, 3*inner) and w_out (inner, dim)
    are bf16 with the softmax scale pre-folded into the Q columns."""
    B, N, dim = x.shape
    inner = heads * dim_head

    kern = functools.partial(_attn_layer_kernel, heads=heads, dim_head=dim_head)
    cost = pl.CostEstimate(
        flops=(2 * B * N * dim * 3 * inner            # QKV projection
               + 4 * B * heads * N * N * dim_head     # scores + PV
               + 2 * B * N * inner * dim),            # output projection
        transcendentals=B * heads * N * N,            # softmax exp
        bytes_accessed=(4 * 2 * B * N * dim           # x in + out (f32)
                        + 2 * (dim * 3 * inner + inner * dim)  # bf16 weights
                        + 4 * B * N * 3 * inner       # qkv activations
                        + 4 * B * heads * N * N))     # score/softmax traffic

    return pl.pallas_call(
        kern,
        out_shape=jax.ShapeDtypeStruct((B, N, dim), x.dtype),
        grid=(B,),
        in_specs=[pl.BlockSpec((1, N, dim), lambda i: (i, 0, 0)),
                  pl.BlockSpec((1, dim), lambda i: (0, 0)),
                  pl.BlockSpec((1, dim), lambda i: (0, 0)),
                  pl.BlockSpec((dim, 3 * inner), lambda i: (0, 0)),
                  pl.BlockSpec((inner, dim), lambda i: (0, 0)),
                  pl.BlockSpec((1, dim), lambda i: (0, 0))],
        out_specs=pl.BlockSpec((1, N, dim), lambda i: (i, 0, 0)),
        compiler_params=pltpu.CompilerParams(
            dimension_semantics=("parallel",),
            vmem_limit_bytes=VMEM_LIMIT),
        cost_estimate=cost,
    )(x, g, b, w_qkv, w_out, b_out)


# ----------------------------- parameters -----------------------------

def init_params(key, *, patch_dim, dim, depth, heads, dim_head, mlp_dim,
                num_patches, num_classes):
    """Torch-layout f32 parameters (what the PyTorch module would hold)."""
    inner = heads * dim_head
    keys = iter(jax.random.split(key, 64))

    def nrm(shape, scale=0.02):
        return (scale * jax.random.normal(next(keys), shape)).astype(jnp.float32)

    p = {
        "pe_ln1_g": jnp.ones((patch_dim,), jnp.float32),
        "pe_ln1_b": jnp.zeros((patch_dim,), jnp.float32),
        "pe_w": nrm((patch_dim, dim)),
        "pe_b": jnp.zeros((dim,), jnp.float32),
        "pe_ln2_g": jnp.ones((dim,), jnp.float32),
        "pe_ln2_b": jnp.zeros((dim,), jnp.float32),
        "pos": nrm((1, num_patches + 1, dim), 1.0),    # torch.randn
        "cls": nrm((1, 1, dim), 1.0),                  # torch.randn
        "final_ln_g": jnp.ones((dim,), jnp.float32),
        "final_ln_b": jnp.zeros((dim,), jnp.float32),
        "head_w": nrm((dim, num_classes)),
        "head_b": jnp.zeros((num_classes,), jnp.float32),
        "layers": [],
    }
    for _ in range(depth):
        p["layers"].append({
            "attn_ln_g": jnp.ones((dim,), jnp.float32),
            "attn_ln_b": jnp.zeros((dim,), jnp.float32),
            "w_qkv": nrm((dim, inner * 3)),            # to_qkv has no bias
            "w_out": nrm((inner, dim)),
            "b_out": jnp.zeros((dim,), jnp.float32),
            "ff_ln_g": jnp.ones((dim,), jnp.float32),
            "ff_ln_b": jnp.zeros((dim,), jnp.float32),
            "ff_w1": nrm((dim, mlp_dim)),
            "ff_b1": jnp.zeros((mlp_dim,), jnp.float32),
            "ff_w2": nrm((mlp_dim, dim)),
            "ff_b2": jnp.zeros((dim,), jnp.float32),
        })
    return p


def prepare_params(p, *, heads, dim_head):
    """One-time weight prep: bf16 cast, (1, D) LN/bias layout, softmax scale
    baked into the Q columns of w_qkv, lane-dense (128-padded) classifier."""
    inner = heads * dim_head
    dim = p["pe_w"].shape[1]
    scale = dim_head ** (-0.5)

    def v(a):  # (1, D) f32 row vector
        return a.reshape(1, -1).astype(jnp.float32)

    nc = p["head_w"].shape[1]
    ncp = ((nc + 127) // 128) * 128                     # lane-dense head width
    head_w = jnp.zeros((dim, ncp), jnp.float32).at[:, :nc].set(p["head_w"])
    head_b = jnp.zeros((1, ncp), jnp.float32).at[0, :nc].set(p["head_b"])

    out = {
        "pe_ln1_g": v(p["pe_ln1_g"]), "pe_ln1_b": v(p["pe_ln1_b"]),
        "pe_w": p["pe_w"].astype(jnp.bfloat16),
        "pe_b": v(p["pe_b"]),
        "pe_ln2_g": v(p["pe_ln2_g"]), "pe_ln2_b": v(p["pe_ln2_b"]),
        "pos": p["pos"], "cls": p["cls"],
        "final_ln_g": v(p["final_ln_g"]), "final_ln_b": v(p["final_ln_b"]),
        "head_w": head_w.astype(jnp.bfloat16),
        "head_b": head_b,
        "layers": [],
    }
    for lyr in p["layers"]:
        w_qkv = lyr["w_qkv"].at[:, :inner].multiply(scale)   # fold 1/sqrt(dh) into Q
        out["layers"].append({
            "attn_ln_g": v(lyr["attn_ln_g"]), "attn_ln_b": v(lyr["attn_ln_b"]),
            "w_qkv": w_qkv.astype(jnp.bfloat16),
            "w_out": lyr["w_out"].astype(jnp.bfloat16),
            "b_out": v(lyr["b_out"]),
            "ff_ln_g": v(lyr["ff_ln_g"]), "ff_ln_b": v(lyr["ff_ln_b"]),
            "ff_w1": lyr["ff_w1"].astype(jnp.bfloat16),
            "ff_b1": v(lyr["ff_b1"]),
            "ff_w2": lyr["ff_w2"].astype(jnp.bfloat16),
            "ff_b2": v(lyr["ff_b2"]),
        })
    return out


# ----------------------------- ViT forward -----------------------------

def vit_forward(params, img, *, patch_size, heads, dim_head, num_classes,
                pool="cls"):
    B, C, H, W = img.shape
    ph = pw = patch_size
    hh, ww = H // ph, W // pw
    n = hh * ww
    dim = params["pe_w"].shape[1]

    # Rearrange 'b c (h p1) (w p2) -> b (h w) (p1 p2 c)'  (plain-JAX glue)
    x = img.reshape(B, C, hh, ph, ww, pw)
    x = jnp.transpose(x, (0, 2, 4, 3, 5, 1))
    x = x.reshape(B * n, ph * pw * C)

    # patch embedding: LN -> Linear -> LN fused in one row-tiled kernel
    x = tiled_matmul(x, params["pe_w"],
                     ln=(params["pe_ln1_g"], params["pe_ln1_b"]),
                     bias=params["pe_b"],
                     ln2=(params["pe_ln2_g"], params["pe_ln2_b"]))
    x = x.reshape(B, n, dim)

    # cls token + positional embedding; dropout(p=0) == identity
    cls = jnp.broadcast_to(params["cls"], (B, 1, dim))
    x = jnp.concatenate([cls, x], axis=1) + params["pos"][:, : n + 1]
    N = n + 1

    for lyr in params["layers"]:
        # attention block: LN + fused QKV + softmax(QK^T)V + out-proj + residual
        x = attention_block(x, lyr["attn_ln_g"], lyr["attn_ln_b"],
                            lyr["w_qkv"], lyr["w_out"], lyr["b_out"],
                            heads=heads, dim_head=dim_head)
        # feed-forward block: LN + W1 + GELU + W2 + residual (one kernel)
        x2 = ff_block(x.reshape(B * N, dim), lyr["ff_ln_g"], lyr["ff_ln_b"],
                      lyr["ff_w1"], lyr["ff_b1"], lyr["ff_w2"], lyr["ff_b2"])
        x = x2.reshape(B, N, dim)

    if pool == "mean":
        # final LN must run per-token before the mean (LN doesn't commute with mean)
        xn = tiled_layernorm(x.reshape(B * N, dim),
                             params["final_ln_g"], params["final_ln_b"])
        pooled = jnp.mean(xn.reshape(B, N, dim), axis=1)
        logits = tiled_matmul(pooled, params["head_w"], bias=params["head_b"])
        return logits[:, :num_classes]

    # 'cls' pooling: LN commutes with row selection -> pool first, then fuse
    # the final LN with the (lane-dense, padded) classification head.
    pooled = x[:, 0]
    logits = tiled_matmul(pooled, params["head_w"],
                          ln=(params["final_ln_g"], params["final_ln_b"]),
                          bias=params["head_b"])
    return logits[:, :num_classes]


# ----------------------------- main -----------------------------

if __name__ == "__main__":
    key = jax.random.PRNGKey(0)
    kimg, kpar = jax.random.split(key)

    # Small shapes consistent with the module's constructor contract.
    # dim chosen as a multiple of 128 so all in-layer outputs are lane-dense.
    B, C, H, W = 2, 3, 32, 32
    patch_size = 8
    dim, depth, heads, dim_head = 128, 2, 4, 32
    mlp_dim, num_classes = 256, 10
    num_patches = (H // patch_size) * (W // patch_size)   # 16 -> seq len 17
    patch_dim = C * patch_size * patch_size               # 192

    img = jax.random.normal(kimg, (B, C, H, W), jnp.float32)
    raw = init_params(kpar, patch_dim=patch_dim, dim=dim, depth=depth,
                      heads=heads, dim_head=dim_head, mlp_dim=mlp_dim,
                      num_patches=num_patches, num_classes=num_classes)
    params = prepare_params(raw, heads=heads, dim_head=dim_head)  # one-time prep

    fwd = jax.jit(functools.partial(vit_forward, patch_size=patch_size,
                                    heads=heads, dim_head=dim_head,
                                    num_classes=num_classes, pool="cls"))
    out = fwd(params, img)
    jax.block_until_ready(out)
    assert out.shape == (B, num_classes) and out.dtype == jnp.float32
    print("KERNEL_OK")
</pallas_src>

<mosaic_0001>
module attributes {stable_mosaic.version = 11 : i64} {
  func.func @kernel(%arg0: i32, %arg1: memref<32x192xf32, #tpu.memory_space<vmem>>, %arg2: memref<1x192xf32, #tpu.memory_space<vmem>>, %arg3: memref<1x192xf32, #tpu.memory_space<vmem>>, %arg4: memref<192x128xbf16, #tpu.memory_space<vmem>>, %arg5: memref<1x128xf32, #tpu.memory_space<vmem>>, %arg6: memref<1x128xf32, #tpu.memory_space<vmem>>, %arg7: memref<1x128xf32, #tpu.memory_space<vmem>>, %arg8: memref<32x128xf32, #tpu.memory_space<vmem>>) attributes {dimension_semantics = [#tpu.dimension_semantics<parallel>], iteration_bounds = array<i64: 1>, scalar_prefetch = 0 : i64, scratch_operands = 0 : i64, tpu.core_type = #tpu.core_type<tc>, window_params = [{transform_indices = @transform_0, window_bounds = array<i64: 32, 192>}, {pipeline_mode = #tpu.pipeline_mode<synchronous>, transform_indices = @transform_1, window_bounds = array<i64: 1, 192>}, {pipeline_mode = #tpu.pipeline_mode<synchronous>, transform_indices = @transform_2, window_bounds = array<i64: 1, 192>}, {pipeline_mode = #tpu.pipeline_mode<synchronous>, transform_indices = @transform_3, window_bounds = array<i64: 192, 128>}, {pipeline_mode = #tpu.pipeline_mode<synchronous>, transform_indices = @transform_4, window_bounds = array<i64: 1, 128>}, {pipeline_mode = #tpu.pipeline_mode<synchronous>, transform_indices = @transform_5, window_bounds = array<i64: 1, 128>}, {pipeline_mode = #tpu.pipeline_mode<synchronous>, transform_indices = @transform_6, window_bounds = array<i64: 1, 128>}, {transform_indices = @transform_7, window_bounds = array<i64: 32, 128>}]} {
    %c0 = arith.constant 0 : index
    %c0_0 = arith.constant 0 : index
    %0 = vector.load %arg1[%c0, %c0_0] : memref<32x192xf32, #tpu.memory_space<vmem>>, vector<32x192xf32>
    %c0_1 = arith.constant 0 : index
    %c0_2 = arith.constant 0 : index
    %1 = vector.load %arg2[%c0_1, %c0_2] : memref<1x192xf32, #tpu.memory_space<vmem>>, vector<1x192xf32>
    %c0_3 = arith.constant 0 : index
    %c0_4 = arith.constant 0 : index
    %2 = vector.load %arg3[%c0_3, %c0_4] : memref<1x192xf32, #tpu.memory_space<vmem>>, vector<1x192xf32>
    %cst = arith.constant dense<0.000000e+00> : vector<32xf32>
    %3 = vector.multi_reduction <add>, %0, %cst [1] : vector<32x192xf32> to vector<32xf32>
    %4 = vector.shape_cast %3 : vector<32xf32> to vector<32x1xf32>
    %cst_5 = arith.constant 1.920000e+02 : f32
    %5 = vector.broadcast %cst_5 : f32 to vector<32x1xf32>
    %6 = arith.divf %4, %5 : vector<32x1xf32>
    %7 = vector.broadcast %6 : vector<32x1xf32> to vector<32x192xf32>
    %8 = arith.subf %0, %7 : vector<32x192xf32>
    %9 = arith.mulf %8, %8 : vector<32x192xf32>
    %cst_6 = arith.constant dense<0.000000e+00> : vector<32xf32>
    %10 = vector.multi_reduction <add>, %9, %cst_6 [1] : vector<32x192xf32> to vector<32xf32>
    %11 = vector.shape_cast %10 : vector<32xf32> to vector<32x1xf32>
    %cst_7 = arith.constant 1.920000e+02 : f32
    %12 = vector.broadcast %cst_7 : f32 to vector<32x1xf32>
    %13 = arith.divf %11, %12 : vector<32x1xf32>
    %14 = vector.broadcast %6 : vector<32x1xf32> to vector<32x192xf32>
    %15 = arith.subf %0, %14 : vector<32x192xf32>
    %cst_8 = arith.constant 9.99999974E-6 : f32
    %16 = vector.broadcast %cst_8 : f32 to vector<32x1xf32>
    %17 = arith.addf %13, %16 : vector<32x1xf32>
    %18 = math.rsqrt %17 : vector<32x1xf32>
    %19 = vector.broadcast %18 : vector<32x1xf32> to vector<32x192xf32>
    %20 = arith.mulf %15, %19 : vector<32x192xf32>
    %21 = vector.broadcast %1 : vector<1x192xf32> to vector<32x192xf32>
    %22 = arith.mulf %20, %21 : vector<32x192xf32>
    %23 = vector.broadcast %2 : vector<1x192xf32> to vector<32x192xf32>
    %24 = arith.addf %22, %23 : vector<32x192xf32>
    %c0_9 = arith.constant 0 : index
    %c0_10 = arith.constant 0 : index
    %25 = vector.load %arg4[%c0_9, %c0_10] : memref<192x128xbf16, #tpu.memory_space<vmem>>, vector<192x128xbf16>
    %26 = arith.truncf %24 : vector<32x192xf32> to vector<32x192xbf16>
    %cst_11 = arith.constant dense<0.000000e+00> : vector<32x128xf32>
    %27 = tpu.matmul %26, %25, %cst_11 {dimension_numbers = #tpu.dot_dimension_numbers<[1], [0], [0], [1], [0, 0, 1, 1], [], []>} : vector<32x192xbf16>, vector<192x128xbf16>, vector<32x128xf32> -> vector<32x128xf32>
    %c0_12 = arith.constant 0 : index
    %c0_13 = arith.constant 0 : index
    %28 = vector.load %arg5[%c0_12, %c0_13] : memref<1x128xf32, #tpu.memory_space<vmem>>, vector<1x128xf32>
    %29 = vector.broadcast %28 : vector<1x128xf32> to vector<32x128xf32>
    %30 = arith.addf %27, %29 : vector<32x128xf32>
    %c0_14 = arith.constant 0 : index
    %c0_15 = arith.constant 0 : index
    %31 = vector.load %arg6[%c0_14, %c0_15] : memref<1x128xf32, #tpu.memory_space<vmem>>, vector<1x128xf32>
    %c0_16 = arith.constant 0 : index
    %c0_17 = arith.constant 0 : index
    %32 = vector.load %arg7[%c0_16, %c0_17] : memref<1x128xf32, #tpu.memory_space<vmem>>, vector<1x128xf32>
    %cst_18 = arith.constant dense<0.000000e+00> : vector<32xf32>
    %33 = vector.multi_reduction <add>, %30, %cst_18 [1] : vector<32x128xf32> to vector<32xf32>
    %34 = vector.shape_cast %33 : vector<32xf32> to vector<32x1xf32>
    %cst_19 = arith.constant 1.280000e+02 : f32
    %35 = vector.broadcast %cst_19 : f32 to vector<32x1xf32>
    %36 = arith.divf %34, %35 : vector<32x1xf32>
    %37 = vector.broadcast %36 : vector<32x1xf32> to vector<32x128xf32>
    %38 = arith.subf %30, %37 : vector<32x128xf32>
    %39 = arith.mulf %38, %38 : vector<32x128xf32>
    %cst_20 = arith.constant dense<0.000000e+00> : vector<32xf32>
    %40 = vector.multi_reduction <add>, %39, %cst_20 [1] : vector<32x128xf32> to vector<32xf32>
    %41 = vector.shape_cast %40 : vector<32xf32> to vector<32x1xf32>
    %cst_21 = arith.constant 1.280000e+02 : f32
    %42 = vector.broadcast %cst_21 : f32 to vector<32x1xf32>
    %43 = arith.divf %41, %42 : vector<32x1xf32>
    %44 = vector.broadcast %36 : vector<32x1xf32> to vector<32x128xf32>
    %45 = arith.subf %30, %44 : vector<32x128xf32>
    %cst_22 = arith.constant 9.99999974E-6 : f32
    %46 = vector.broadcast %cst_22 : f32 to vector<32x1xf32>
    %47 = arith.addf %43, %46 : vector<32x1xf32>
    %48 = math.rsqrt %47 : vector<32x1xf32>
    %49 = vector.broadcast %48 : vector<32x1xf32> to vector<32x128xf32>
    %50 = arith.mulf %45, %49 : vector<32x128xf32>
    %51 = vector.broadcast %31 : vector<1x128xf32> to vector<32x128xf32>
    %52 = arith.mulf %50, %51 : vector<32x128xf32>
    %53 = vector.broadcast %32 : vector<1x128xf32> to vector<32x128xf32>
    %54 = arith.addf %52, %53 : vector<32x128xf32>
    %c0_23 = arith.constant 0 : index
    %c0_24 = arith.constant 0 : index
    %55 = vector.load %arg8[%c0_23, %c0_24] : memref<32x128xf32, #tpu.memory_space<vmem>>, vector<32x128xf32>
    tpu.vector_store %arg8[%c0_23, %c0_24], %54 {strides = array<i32>} : memref<32x128xf32, #tpu.memory_space<vmem>>, vector<32x128xf32>,
    return
  }
  func.func @transform_0(%arg0: i32) -> (i32, i32) {
    %c0_i32 = arith.constant 0 : i32
    %c0_i32_0 = arith.constant 0 : i32
    return %arg0, %c0_i32 : i32, i32
  }
  func.func @transform_1(%arg0: i32) -> (i32, i32) {
    %c0_i32 = arith.constant 0 : i32
    %c0_i32_0 = arith.constant 0 : i32
    %c0_i32_1 = arith.constant 0 : i32
    return %c0_i32, %c0_i32_0 : i32, i32
  }
  func.func @transform_2(%arg0: i32) -> (i32, i32) {
    %c0_i32 = arith.constant 0 : i32
    %c0_i32_0 = arith.constant 0 : i32
    %c0_i32_1 = arith.constant 0 : i32
    return %c0_i32, %c0_i32_0 : i32, i32
  }
  func.func @transform_3(%arg0: i32) -> (i32, i32) {
    %c0_i32 = arith.constant 0 : i32
    %c0_i32_0 = arith.constant 0 : i32
    %c0_i32_1 = arith.constant 0 : i32
    return %c0_i32, %c0_i32_0 : i32, i32
  }
  func.func @transform_4(%arg0: i32) -> (i32, i32) {
    %c0_i32 = arith.constant 0 : i32
    %c0_i32_0 = arith.constant 0 : i32
    %c0_i32_1 = arith.constant 0 : i32
    return %c0_i32, %c0_i32_0 : i32, i32
  }
  func.func @transform_5(%arg0: i32) -> (i32, i32) {
    %c0_i32 = arith.constant 0 : i32
    %c0_i32_0 = arith.constant 0 : i32
    %c0_i32_1 = arith.constant 0 : i32
    return %c0_i32, %c0_i32_0 : i32, i32
  }
  func.func @transform_6(%arg0: i32) -> (i32, i32) {
    %c0_i32 = arith.constant 0 : i32
    %c0_i32_0 = arith.constant 0 : i32
    %c0_i32_1 = arith.constant 0 : i32
    return %c0_i32, %c0_i32_0 : i32, i32
  }
  func.func @transform_7(%arg0: i32) -> (i32, i32) {
    %c0_i32 = arith.constant 0 : i32
    %c0_i32_0 = arith.constant 0 : i32
    return %arg0, %c0_i32 : i32, i32
  }
}

module attributes {stable_mosaic.version = 11 : i64} {
  func.func @_attn_layer_kernel(%arg0: i32, %arg1: memref<1x17x128xf32, #tpu.memory_space<vmem>>, %arg2: memref<1x128xf32, #tpu.memory_space<vmem>>, %arg3: memref<1x128xf32, #tpu.memory_space<vmem>>, %arg4: memref<128x384xbf16, #tpu.memory_space<vmem>>, %arg5: memref<128x128xbf16, #tpu.memory_space<vmem>>, %arg6: memref<1x128xf32, #tpu.memory_space<vmem>>, %arg7: memref<1x17x128xf32, #tpu.memory_space<vmem>>) attributes {dimension_semantics = [#tpu.dimension_semantics<parallel>], iteration_bounds = array<i64: 2>, scalar_prefetch = 0 : i64, scratch_operands = 0 : i64, tpu.core_type = #tpu.core_type<tc>, window_params = [{transform_indices = @transform_0, window_bounds = array<i64: 1, 17, 128>}, {pipeline_mode = #tpu.pipeline_mode<synchronous>, transform_indices = @transform_1, window_bounds = array<i64: 1, 128>}, {pipeline_mode = #tpu.pipeline_mode<synchronous>, transform_indices = @transform_2, window_bounds = array<i64: 1, 128>}, {pipeline_mode = #tpu.pipeline_mode<synchronous>, transform_indices = @transform_3, window_bounds = array<i64: 128, 384>}, {pipeline_mode = #tpu.pipeline_mode<synchronous>, transform_indices = @transform_4, window_bounds = array<i64: 128, 128>}, {pipeline_mode = #tpu.pipeline_mode<synchronous>, transform_indices = @transform_5, window_bounds = array<i64: 1, 128>}, {transform_indices = @transform_6, window_bounds = array<i64: 1, 17, 128>}]} {
    %c0 = arith.constant 0 : index
    %c0_0 = arith.constant 0 : index
    %c0_1 = arith.constant 0 : index
    %0 = vector.load %arg1[%c0, %c0_0, %c0_1] : memref<1x17x128xf32, #tpu.memory_space<vmem>>, vector<1x17x128xf32>
    %1 = vector.shape_cast %0 : vector<1x17x128xf32> to vector<17x128xf32>
    %c0_2 = arith.constant 0 : index
    %c0_3 = arith.constant 0 : index
    %2 = vector.load %arg2[%c0_2, %c0_3] : memref<1x128xf32, #tpu.memory_space<vmem>>, vector<1x128xf32>
    %c0_4 = arith.constant 0 : index
    %c0_5 = arith.constant 0 : index
    %3 = vector.load %arg3[%c0_4, %c0_5] : memref<1x128xf32, #tpu.memory_space<vmem>>, vector<1x128xf32>
    %cst = arith.constant dense<0.000000e+00> : vector<17xf32>
    %4 = vector.multi_reduction <add>, %1, %cst [1] : vector<17x128xf32> to vector<17xf32>
    %5 = vector.shape_cast %4 : vector<17xf32> to vector<17x1xf32>
    %cst_6 = arith.constant 1.280000e+02 : f32
    %6 = vector.broadcast %cst_6 : f32 to vector<17x1xf32>
    %7 = arith.divf %5, %6 : vector<17x1xf32>
    %8 = vector.broadcast %7 : vector<17x1xf32> to vector<17x128xf32>
    %9 = arith.subf %1, %8 : vector<17x128xf32>
    %10 = arith.mulf %9, %9 : vector<17x128xf32>
    %cst_7 = arith.constant dense<0.000000e+00> : vector<17xf32>
    %11 = vector.multi_reduction <add>, %10, %cst_7 [1] : vector<17x128xf32> to vector<17xf32>
    %12 = vector.shape_cast %11 : vector<17xf32> to vector<17x1xf32>
    %cst_8 = arith.constant 1.280000e+02 : f32
    %13 = vector.broadcast %cst_8 : f32 to vector<17x1xf32>
    %14 = arith.divf %12, %13 : vector<17x1xf32>
    %15 = vector.broadcast %7 : vector<17x1xf32> to vector<17x128xf32>
    %16 = arith.subf %1, %15 : vector<17x128xf32>
    %cst_9 = arith.constant 9.99999974E-6 : f32
    %17 = vector.broadcast %cst_9 : f32 to vector<17x1xf32>
    %18 = arith.addf %14, %17 : vector<17x1xf32>
    %19 = math.rsqrt %18 : vector<17x1xf32>
    %20 = vector.broadcast %19 : vector<17x1xf32> to vector<17x128xf32>
    %21 = arith.mulf %16, %20 : vector<17x128xf32>
    %22 = vector.broadcast %2 : vector<1x128xf32> to vector<17x128xf32>
    %23 = arith.mulf %21, %22 : vector<17x128xf32>
    %24 = vector.broadcast %3 : vector<1x128xf32> to vector<17x128xf32>
    %25 = arith.addf %23, %24 : vector<17x128xf32>
    %26 = arith.truncf %25 : vector<17x128xf32> to vector<17x128xbf16>
    %c0_10 = arith.constant 0 : index
    %c0_11 = arith.constant 0 : index
    %27 = vector.load %arg4[%c0_10, %c0_11] : memref<128x384xbf16, #tpu.memory_space<vmem>>, vector<128x384xbf16>
    %cst_12 = arith.constant dense<0.000000e+00> : vector<17x384xf32>
    %28 = tpu.matmul %26, %27, %cst_12 {dimension_numbers = #tpu.dot_dimension_numbers<[1], [0], [0], [1], [0, 0, 1, 1], [], []>} : vector<17x128xbf16>, vector<128x384xbf16>, vector<17x384xf32> -> vector<17x384xf32>
    %29 = vector.extract_strided_slice %28 {offsets = [0, 0], sizes = [17, 32], strides = [1, 1]} : vector<17x384xf32> to vector<17x32xf32>
    %30 = arith.truncf %29 : vector<17x32xf32> to vector<17x32xbf16>
    %31 = vector.extract_strided_slice %28 {offsets = [0, 128], sizes = [17, 32], strides = [1, 1]} : vector<17x384xf32> to vector<17x32xf32>
    %32 = arith.truncf %31 : vector<17x32xf32> to vector<17x32xbf16>
    %33 = vector.extract_strided_slice %28 {offsets = [0, 256], sizes = [17, 32], strides = [1, 1]} : vector<17x384xf32> to vector<17x32xf32>
    %34 = arith.truncf %33 : vector<17x32xf32> to vector<17x32xbf16>
    %cst_13 = arith.constant dense<0.000000e+00> : vector<17x17xf32>
    %35 = tpu.matmul %30, %32, %cst_13 {dimension_numbers = #tpu.dot_dimension_numbers<[1], [1], [0], [0], [0, 0, 1, 0], [], []>} : vector<17x32xbf16>, vector<17x32xbf16>, vector<17x17xf32> -> vector<17x17xf32>
    %cst_14 = arith.constant dense<0xFF800000> : vector<17xf32>
    %36 = vector.multi_reduction <maximumf>, %35, %cst_14 [1] : vector<17x17xf32> to vector<17xf32>
    %37 = vector.shape_cast %36 : vector<17xf32> to vector<17x1xf32>
    %38 = vector.broadcast %37 : vector<17x1xf32> to vector<17x17xf32>
    %39 = arith.subf %35, %38 : vector<17x17xf32>
    %40 = math.exp %39 : vector<17x17xf32>
    %cst_15 = arith.constant dense<0.000000e+00> : vector<17xf32>
    %41 = vector.multi_reduction <add>, %40, %cst_15 [1] : vector<17x17xf32> to vector<17xf32>
    %42 = vector.shape_cast %41 : vector<17xf32> to vector<17x1xf32>
    %43 = tpu.reciprocal %42 {approx = true} : vector<17x1xf32> -> vector<17x1xf32>
    %44 = vector.broadcast %43 : vector<17x1xf32> to vector<17x17xf32>
    %45 = arith.mulf %40, %44 : vector<17x17xf32>
    %46 = arith.truncf %45 : vector<17x17xf32> to vector<17x17xbf16>
    %cst_16 = arith.constant dense<0.000000e+00> : vector<17x32xf32>
    %47 = tpu.matmul %46, %34, %cst_16 {dimension_numbers = #tpu.dot_dimension_numbers<[1], [0], [0], [1], [0, 0, 1, 1], [], []>} : vector<17x17xbf16>, vector<17x32xbf16>, vector<17x32xf32> -> vector<17x32xf32>
    %48 = vector.extract_strided_slice %28 {offsets = [0, 32], sizes = [17, 32], strides = [1, 1]} : vector<17x384xf32> to vector<17x32xf32>
    %49 = arith.truncf %48 : vector<17x32xf32> to vector<17x32xbf16>
    %50 = vector.extract_strided_slice %28 {offsets = [0, 160], sizes = [17, 32], strides = [1, 1]} : vector<17x384xf32> to vector<17x32xf32>
    %51 = arith.truncf %50 : vector<17x32xf32> to vector<17x32xbf16>
    %52 = vector.extract_strided_slice %28 {offsets = [0, 288], sizes = [17, 32], strides = [1, 1]} : vector<17x384xf32> to vector<17x32xf32>
    %53 = arith.truncf %52 : vector<17x32xf32> to vector<17x32xbf16>
    %cst_17 = arith.constant dense<0.000000e+00> : vector<17x17xf32>
    %54 = tpu.matmul %49, %51, %cst_17 {dimension_numbers = #tpu.dot_dimension_numbers<[1], [1], [0], [0], [0, 0, 1, 0], [], []>} : vector<17x32xbf16>, vector<17x32xbf16>, vector<17x17xf32> -> vector<17x17xf32>
    %cst_18 = arith.constant dense<0xFF800000> : vector<17xf32>
    %55 = vector.multi_reduction <maximumf>, %54, %cst_18 [1] : vector<17x17xf32> to vector<17xf32>
    %56 = vector.shape_cast %55 : vector<17xf32> to vector<17x1xf32>
    %57 = vector.broadcast %56 : vector<17x1xf32> to vector<17x17xf32>
    %58 = arith.subf %54, %57 : vector<17x17xf32>
    %59 = math.exp %58 : vector<17x17xf32>
    %cst_19 = arith.constant dense<0.000000e+00> : vector<17xf32>
    %60 = vector.multi_reduction <add>, %59, %cst_19 [1] : vector<17x17xf32> to vector<17xf32>
    %61 = vector.shape_cast %60 : vector<17xf32> to vector<17x1xf32>
    %62 = tpu.reciprocal %61 {approx = true} : vector<17x1xf32> -> vector<17x1xf32>
    %63 = vector.broadcast %62 : vector<17x1xf32> to vector<17x17xf32>
    %64 = arith.mulf %59, %63 : vector<17x17xf32>
    %65 = arith.truncf %64 : vector<17x17xf32> to vector<17x17xbf16>
    %cst_20 = arith.constant dense<0.000000e+00> : vector<17x32xf32>
    %66 = tpu.matmul %65, %53, %cst_20 {dimension_numbers = #tpu.dot_dimension_numbers<[1], [0], [0], [1], [0, 0, 1, 1], [], []>} : vector<17x17xbf16>, vector<17x32xbf16>, vector<17x32xf32> -> vector<17x32xf32>
    %67 = vector.extract_strided_slice %28 {offsets = [0, 64], sizes = [17, 32], strides = [1, 1]} : vector<17x384xf32> to vector<17x32xf32>
    %68 = arith.truncf %67 : vector<17x32xf32> to vector<17x32xbf16>
    %69 = vector.extract_strided_slice %28 {offsets = [0, 192], sizes = [17, 32], strides = [1, 1]} : vector<17x384xf32> to vector<17x32xf32>
    %70 = arith.truncf %69 : vector<17x32xf32> to vector<17x32xbf16>
    %71 = vector.extract_strided_slice %28 {offsets = [0, 320], sizes = [17, 32], strides = [1, 1]} : vector<17x384xf32> to vector<17x32xf32>
    %72 = arith.truncf %71 : vector<17x32xf32> to vector<17x32xbf16>
    %cst_21 = arith.constant dense<0.000000e+00> : vector<17x17xf32>
    %73 = tpu.matmul %68, %70, %cst_21 {dimension_numbers = #tpu.dot_dimension_numbers<[1], [1], [0], [0], [0, 0, 1, 0], [], []>} : vector<17x32xbf16>, vector<17x32xbf16>, vector<17x17xf32> -> vector<17x17xf32>
    %cst_22 = arith.constant dense<0xFF800000> : vector<17xf32>
    %74 = vector.multi_reduction <maximumf>, %73, %cst_22 [1] : vector<17x17xf32> to vector<17xf32>
    %75 = vector.shape_cast %74 : vector<17xf32> to vector<17x1xf32>
    %76 = vector.broadcast %75 : vector<17x1xf32> to vector<17x17xf32>
    %77 = arith.subf %73, %76 : vector<17x17xf32>
    %78 = math.exp %77 : vector<17x17xf32>
    %cst_23 = arith.constant dense<0.000000e+00> : vector<17xf32>
    %79 = vector.multi_reduction <add>, %78, %cst_23 [1] : vector<17x17xf32> to vector<17xf32>
    %80 = vector.shape_cast %79 : vector<17xf32> to vector<17x1xf32>
    %81 = tpu.reciprocal %80 {approx = true} : vector<17x1xf32> -> vector<17x1xf32>
    %82 = vector.broadcast %81 : vector<17x1xf32> to vector<17x17xf32>
    %83 = arith.mulf %78, %82 : vector<17x17xf32>
    %84 = arith.truncf %83 : vector<17x17xf32> to vector<17x17xbf16>
    %cst_24 = arith.constant dense<0.000000e+00> : vector<17x32xf32>
    %85 = tpu.matmul %84, %72, %cst_24 {dimension_numbers = #tpu.dot_dimension_numbers<[1], [0], [0], [1], [0, 0, 1, 1], [], []>} : vector<17x17xbf16>, vector<17x32xbf16>, vector<17x32xf32> -> vector<17x32xf32>
    %86 = vector.extract_strided_slice %28 {offsets = [0, 96], sizes = [17, 32], strides = [1, 1]} : vector<17x384xf32> to vector<17x32xf32>
    %87 = arith.truncf %86 : vector<17x32xf32> to vector<17x32xbf16>
    %88 = vector.extract_strided_slice %28 {offsets = [0, 224], sizes = [17, 32], strides = [1, 1]} : vector<17x384xf32> to vector<17x32xf32>
    %89 = arith.truncf %88 : vector<17x32xf32> to vector<17x32xbf16>
    %90 = vector.extract_strided_slice %28 {offsets = [0, 352], sizes = [17, 32], strides = [1, 1]} : vector<17x384xf32> to vector<17x32xf32>
    %91 = arith.truncf %90 : vector<17x32xf32> to vector<17x32xbf16>
    %cst_25 = arith.constant dense<0.000000e+00> : vector<17x17xf32>
    %92 = tpu.matmul %87, %89, %cst_25 {dimension_numbers = #tpu.dot_dimension_numbers<[1], [1], [0], [0], [0, 0, 1, 0], [], []>} : vector<17x32xbf16>, vector<17x32xbf16>, vector<17x17xf32> -> vector<17x17xf32>
    %cst_26 = arith.constant dense<0xFF800000> : vector<17xf32>
    %93 = vector.multi_reduction <maximumf>, %92, %cst_26 [1] : vector<17x17xf32> to vector<17xf32>
    %94 = vector.shape_cast %93 : vector<17xf32> to vector<17x1xf32>
    %95 = vector.broadcast %94 : vector<17x1xf32> to vector<17x17xf32>
    %96 = arith.subf %92, %95 : vector<17x17xf32>
    %97 = math.exp %96 : vector<17x17xf32>
    %cst_27 = arith.constant dense<0.000000e+00> : vector<17xf32>
    %98 = vector.multi_reduction <add>, %97, %cst_27 [1] : vector<17x17xf32> to vector<17xf32>
    %99 = vector.shape_cast %98 : vector<17xf32> to vector<17x1xf32>
    %100 = tpu.reciprocal %99 {approx = true} : vector<17x1xf32> -> vector<17x1xf32>
    %101 = vector.broadcast %100 : vector<17x1xf32> to vector<17x17xf32>
    %102 = arith.mulf %97, %101 : vector<17x17xf32>
    %103 = arith.truncf %102 : vector<17x17xf32> to vector<17x17xbf16>
    %cst_28 = arith.constant dense<0.000000e+00> : vector<17x32xf32>
    %104 = tpu.matmul %103, %91, %cst_28 {dimension_numbers = #tpu.dot_dimension_numbers<[1], [0], [0], [1], [0, 0, 1, 1], [], []>} : vector<17x17xbf16>, vector<17x32xbf16>, vector<17x32xf32> -> vector<17x32xf32>
    %105 = tpu.concatenate %47, %66, %85, %104 in 1 : vector<17x32xf32>, vector<17x32xf32>, vector<17x32xf32>, vector<17x32xf32> -> vector<17x128xf32>
    %106 = arith.truncf %105 : vector<17x128xf32> to vector<17x128xbf16>
    %c0_29 = arith.constant 0 : index
    %c0_30 = arith.constant 0 : index
    %107 = vector.load %arg5[%c0_29, %c0_30] : memref<128x128xbf16, #tpu.memory_space<vmem>>, vector<128x128xbf16>
    %cst_31 = arith.constant dense<0.000000e+00> : vector<17x128xf32>
    %108 = tpu.matmul %106, %107, %cst_31 {dimension_numbers = #tpu.dot_dimension_numbers<[1], [0], [0], [1], [0, 0, 1, 1], [], []>} : vector<17x128xbf16>, vector<128x128xbf16>, vector<17x128xf32> -> vector<17x128xf32>
    %109 = arith.addf %1, %108 : vector<17x128xf32>
    %c0_32 = arith.constant 0 : index
    %c0_33 = arith.constant 0 : index
    %110 = vector.load %arg6[%c0_32, %c0_33] : memref<1x128xf32, #tpu.memory_space<vmem>>, vector<1x128xf32>
    %111 = vector.broadcast %110 : vector<1x128xf32> to vector<17x128xf32>
    %112 = arith.addf %109, %111 : vector<17x128xf32>
    %c0_34 = arith.constant 0 : index
    %c0_35 = arith.constant 0 : index
    %c0_36 = arith.constant 0 : index
    %113 = vector.load %arg7[%c0_34, %c0_35, %c0_36] : memref<1x17x128xf32, #tpu.memory_space<vmem>>, vector<1x17x128xf32>
    %114 = vector.shape_cast %113 : vector<1x17x128xf32> to vector<17x128xf32>
    %115 = vector.shape_cast %112 : vector<17x128xf32> to vector<1x17x128xf32>
    tpu.vector_store %arg7[%c0_34, %c0_35, %c0_36], %115 {strides = array<i32>} : memref<1x17x128xf32, #tpu.memory_space<vmem>>, vector<1x17x128xf32>,
    return
  }
  func.func @transform_0(%arg0: i32) -> (i32, i32, i32) {
    %c0_i32 = arith.constant 0 : i32
    %c0_i32_0 = arith.constant 0 : i32
    %c0_i32_1 = arith.constant 0 : i32
    return %arg0, %c0_i32, %c0_i32_0 : i32, i32, i32
  }
  func.func @transform_1(%arg0: i32) -> (i32, i32) {
    %c0_i32 = arith.constant 0 : i32
    %c0_i32_0 = arith.constant 0 : i32
    %c0_i32_1 = arith.constant 0 : i32
    return %c0_i32, %c0_i32_0 : i32, i32
  }
  func.func @transform_2(%arg0: i32) -> (i32, i32) {
    %c0_i32 = arith.constant 0 : i32
    %c0_i32_0 = arith.constant 0 : i32
    %c0_i32_1 = arith.constant 0 : i32
    return %c0_i32, %c0_i32_0 : i32, i32
  }
  func.func @transform_3(%arg0: i32) -> (i32, i32) {
    %c0_i32 = arith.constant 0 : i32
    %c0_i32_0 = arith.constant 0 : i32
    %c0_i32_1 = arith.constant 0 : i32
    return %c0_i32, %c0_i32_0 : i32, i32
  }
  func.func @transform_4(%arg0: i32) -> (i32, i32) {
    %c0_i32 = arith.constant 0 : i32
    %c0_i32_0 = arith.constant 0 : i32
    %c0_i32_1 = arith.constant 0 : i32
    return %c0_i32, %c0_i32_0 : i32, i32
  }
  func.func @transform_5(%arg0: i32) -> (i32, i32) {
    %c0_i32 = arith.constant 0 : i32
    %c0_i32_0 = arith.constant 0 : i32
    %c0_i32_1 = arith.constant 0 : i32
    return %c0_i32, %c0_i32_0 : i32, i32
  }
  func.func @transform_6(%arg0: i32) -> (i32, i32, i32) {
    %c0_i32 = arith.constant 0 : i32
    %c0_i32_0 = arith.constant 0 : i32
    %c0_i32_1 = arith.constant 0 : i32
    return %arg0, %c0_i32, %c0_i32_0 : i32, i32, i32
  }
}

module attributes {stable_mosaic.version = 11 : i64} {
  func.func @kernel(%arg0: i32, %arg1: memref<34x128xf32, #tpu.memory_space<vmem>>, %arg2: memref<1x128xf32, #tpu.memory_space<vmem>>, %arg3: memref<1x128xf32, #tpu.memory_space<vmem>>, %arg4: memref<128x256xbf16, #tpu.memory_space<vmem>>, %arg5: memref<1x256xf32, #tpu.memory_space<vmem>>, %arg6: memref<256x128xbf16, #tpu.memory_space<vmem>>, %arg7: memref<1x128xf32, #tpu.memory_space<vmem>>, %arg8: memref<34x128xf32, #tpu.memory_space<vmem>>) attributes {dimension_semantics = [#tpu.dimension_semantics<parallel>], iteration_bounds = array<i64: 1>, scalar_prefetch = 0 : i64, scratch_operands = 0 : i64, tpu.core_type = #tpu.core_type<tc>, window_params = [{transform_indices = @transform_0, window_bounds = array<i64: 34, 128>}, {pipeline_mode = #tpu.pipeline_mode<synchronous>, transform_indices = @transform_1, window_bounds = array<i64: 1, 128>}, {pipeline_mode = #tpu.pipeline_mode<synchronous>, transform_indices = @transform_2, window_bounds = array<i64: 1, 128>}, {pipeline_mode = #tpu.pipeline_mode<synchronous>, transform_indices = @transform_3, window_bounds = array<i64: 128, 256>}, {pipeline_mode = #tpu.pipeline_mode<synchronous>, transform_indices = @transform_4, window_bounds = array<i64: 1, 256>}, {pipeline_mode = #tpu.pipeline_mode<synchronous>, transform_indices = @transform_5, window_bounds = array<i64: 256, 128>}, {pipeline_mode = #tpu.pipeline_mode<synchronous>, transform_indices = @transform_6, window_bounds = array<i64: 1, 128>}, {transform_indices = @transform_7, window_bounds = array<i64: 34, 128>}]} {
    %c0 = arith.constant 0 : index
    %c0_0 = arith.constant 0 : index
    %0 = vector.load %arg1[%c0, %c0_0] : memref<34x128xf32, #tpu.memory_space<vmem>>, vector<34x128xf32>
    %c0_1 = arith.constant 0 : index
    %c0_2 = arith.constant 0 : index
    %1 = vector.load %arg2[%c0_1, %c0_2] : memref<1x128xf32, #tpu.memory_space<vmem>>, vector<1x128xf32>
    %c0_3 = arith.constant 0 : index
    %c0_4 = arith.constant 0 : index
    %2 = vector.load %arg3[%c0_3, %c0_4] : memref<1x128xf32, #tpu.memory_space<vmem>>, vector<1x128xf32>
    %cst = arith.constant dense<0.000000e+00> : vector<34xf32>
    %3 = vector.multi_reduction <add>, %0, %cst [1] : vector<34x128xf32> to vector<34xf32>
    %4 = vector.shape_cast %3 : vector<34xf32> to vector<34x1xf32>
    %cst_5 = arith.constant 1.280000e+02 : f32
    %5 = vector.broadcast %cst_5 : f32 to vector<34x1xf32>
    %6 = arith.divf %4, %5 : vector<34x1xf32>
    %7 = vector.broadcast %6 : vector<34x1xf32> to vector<34x128xf32>
    %8 = arith.subf %0, %7 : vector<34x128xf32>
    %9 = arith.mulf %8, %8 : vector<34x128xf32>
    %cst_6 = arith.constant dense<0.000000e+00> : vector<34xf32>
    %10 = vector.multi_reduction <add>, %9, %cst_6 [1] : vector<34x128xf32> to vector<34xf32>
    %11 = vector.shape_cast %10 : vector<34xf32> to vector<34x1xf32>
    %cst_7 = arith.constant 1.280000e+02 : f32
    %12 = vector.broadcast %cst_7 : f32 to vector<34x1xf32>
    %13 = arith.divf %11, %12 : vector<34x1xf32>
    %14 = vector.broadcast %6 : vector<34x1xf32> to vector<34x128xf32>
    %15 = arith.subf %0, %14 : vector<34x128xf32>
    %cst_8 = arith.constant 9.99999974E-6 : f32
    %16 = vector.broadcast %cst_8 : f32 to vector<34x1xf32>
    %17 = arith.addf %13, %16 : vector<34x1xf32>
    %18 = math.rsqrt %17 : vector<34x1xf32>
    %19 = vector.broadcast %18 : vector<34x1xf32> to vector<34x128xf32>
    %20 = arith.mulf %15, %19 : vector<34x128xf32>
    %21 = vector.broadcast %1 : vector<1x128xf32> to vector<34x128xf32>
    %22 = arith.mulf %20, %21 : vector<34x128xf32>
    %23 = vector.broadcast %2 : vector<1x128xf32> to vector<34x128xf32>
    %24 = arith.addf %22, %23 : vector<34x128xf32>
    %25 = arith.truncf %24 : vector<34x128xf32> to vector<34x128xbf16>
    %c0_9 = arith.constant 0 : index
    %c0_10 = arith.constant 0 : index
    %26 = vector.load %arg4[%c0_9, %c0_10] : memref<128x256xbf16, #tpu.memory_space<vmem>>, vector<128x256xbf16>
    %cst_11 = arith.constant dense<0.000000e+00> : vector<34x256xf32>
    %27 = tpu.matmul %25, %26, %cst_11 {dimension_numbers = #tpu.dot_dimension_numbers<[1], [0], [0], [1], [0, 0, 1, 1], [], []>} : vector<34x128xbf16>, vector<128x256xbf16>, vector<34x256xf32> -> vector<34x256xf32>
    %c0_12 = arith.constant 0 : index
    %c0_13 = arith.constant 0 : index
    %28 = vector.load %arg5[%c0_12, %c0_13] : memref<1x256xf32, #tpu.memory_space<vmem>>, vector<1x256xf32>
    %29 = vector.broadcast %28 : vector<1x256xf32> to vector<34x256xf32>
    %30 = arith.addf %27, %29 : vector<34x256xf32>
    %cst_14 = arith.constant 5.000000e-01 : f32
    %31 = vector.broadcast %cst_14 : f32 to vector<34x256xf32>
    %32 = arith.mulf %31, %30 : vector<34x256xf32>
    %cst_15 = arith.constant 0.707106769 : f32
    %33 = vector.broadcast %cst_15 : f32 to vector<34x256xf32>
    %34 = arith.mulf %30, %33 : vector<34x256xf32>
    %cst_16 = arith.constant 0.000000e+00 : f32
    %35 = vector.broadcast %cst_16 : f32 to vector<34x256xf32>
    %36 = arith.cmpf oge, %34, %35 : vector<34x256xf32>
    %cst_17 = arith.constant 1.000000e+00 : f32
    %cst_18 = arith.constant -1.000000e+00 : f32
    %37 = vector.broadcast %cst_17 : f32 to vector<34x256xf32>
    %38 = vector.broadcast %cst_18 : f32 to vector<34x256xf32>
    %39 = arith.select %36, %37, %38 : vector<34x256xi1>, vector<34x256xf32>
    %40 = math.absf %34 : vector<34x256xf32>
    %cst_19 = arith.constant 0.327591091 : f32
    %41 = vector.broadcast %cst_19 : f32 to vector<34x256xf32>
    %42 = arith.mulf %41, %40 : vector<34x256xf32>
    %cst_20 = arith.constant 1.000000e+00 : f32
    %43 = vector.broadcast %cst_20 : f32 to vector<34x256xf32>
    %44 = arith.addf %43, %42 : vector<34x256xf32>
    %cst_21 = arith.constant 1.000000e+00 : f32
    %45 = vector.broadcast %cst_21 : f32 to vector<34x256xf32>
    %46 = arith.divf %45, %44 : vector<34x256xf32>
    %cst_22 = arith.constant 1.06140542 : f32
    %47 = vector.broadcast %cst_22 : f32 to vector<34x256xf32>
    %48 = arith.mulf %47, %46 : vector<34x256xf32>
    %cst_23 = arith.constant -1.45315206 : f32
    %49 = vector.broadcast %cst_23 : f32 to vector<34x256xf32>
    %50 = arith.addf %48, %49 : vector<34x256xf32>
    %51 = arith.mulf %50, %46 : vector<34x256xf32>
    %cst_24 = arith.constant 1.42141378 : f32
    %52 = vector.broadcast %cst_24 : f32 to vector<34x256xf32>
    %53 = arith.addf %51, %52 : vector<34x256xf32>
    %54 = arith.mulf %53, %46 : vector<34x256xf32>
    %cst_25 = arith.constant -0.284496725 : f32
    %55 = vector.broadcast %cst_25 : f32 to vector<34x256xf32>
    %56 = arith.addf %54, %55 : vector<34x256xf32>
    %57 = arith.mulf %56, %46 : vector<34x256xf32>
    %cst_26 = arith.constant 0.254829586 : f32
    %58 = vector.broadcast %cst_26 : f32 to vector<34x256xf32>
    %59 = arith.addf %57, %58 : vector<34x256xf32>
    %60 = arith.mulf %59, %46 : vector<34x256xf32>
    %cst_27 = arith.constant 0.000000e+00 : f32
    %61 = vector.broadcast %cst_27 : f32 to vector<34x256xf32>
    %62 = arith.subf %61, %40 : vector<34x256xf32>
    %63 = arith.mulf %62, %40 : vector<34x256xf32>
    %64 = math.exp %63 : vector<34x256xf32>
    %65 = arith.mulf %60, %64 : vector<34x256xf32>
    %cst_28 = arith.constant 1.000000e+00 : f32
    %66 = vector.broadcast %cst_28 : f32 to vector<34x256xf32>
    %67 = arith.subf %66, %65 : vector<34x256xf32>
    %68 = arith.mulf %39, %67 : vector<34x256xf32>
    %cst_29 = arith.constant 1.000000e+00 : f32
    %69 = vector.broadcast %cst_29 : f32 to vector<34x256xf32>
    %70 = arith.addf %69, %68 : vector<34x256xf32>
    %71 = arith.mulf %32, %70 : vector<34x256xf32>
    %72 = arith.truncf %71 : vector<34x256xf32> to vector<34x256xbf16>
    %c0_30 = arith.constant 0 : index
    %c0_31 = arith.constant 0 : index
    %73 = vector.load %arg6[%c0_30, %c0_31] : memref<256x128xbf16, #tpu.memory_space<vmem>>, vector<256x128xbf16>
    %cst_32 = arith.constant dense<0.000000e+00> : vector<34x128xf32>
    %74 = tpu.matmul %72, %73, %cst_32 {dimension_numbers = #tpu.dot_dimension_numbers<[1], [0], [0], [1], [0, 0, 1, 1], [], []>} : vector<34x256xbf16>, vector<256x128xbf16>, vector<34x128xf32> -> vector<34x128xf32>
    %c0_33 = arith.constant 0 : index
    %c0_34 = arith.constant 0 : index
    %75 = vector.load %arg7[%c0_33, %c0_34] : memref<1x128xf32, #tpu.memory_space<vmem>>, vector<1x128xf32>
    %76 = vector.broadcast %75 : vector<1x128xf32> to vector<34x128xf32>
    %77 = arith.addf %74, %76 : vector<34x128xf32>
    %78 = arith.addf %77, %0 : vector<34x128xf32>
    %c0_35 = arith.constant 0 : index
    %c0_36 = arith.constant 0 : index
    %79 = vector.load %arg8[%c0_35, %c0_36] : memref<34x128xf32, #tpu.memory_space<vmem>>, vector<34x128xf32>
    tpu.vector_store %arg8[%c0_35, %c0_36], %78 {strides = array<i32>} : memref<34x128xf32, #tpu.memory_space<vmem>>, vector<34x128xf32>,
    return
  }
  func.func @transform_0(%arg0: i32) -> (i32, i32) {
    %c0_i32 = arith.constant 0 : i32
    %c0_i32_0 = arith.constant 0 : i32
    return %arg0, %c0_i32 : i32, i32
  }
  func.func @transform_1(%arg0: i32) -> (i32, i32) {
    %c0_i32 = arith.constant 0 : i32
    %c0_i32_0 = arith.constant 0 : i32
    %c0_i32_1 = arith.constant 0 : i32
    return %c0_i32, %c0_i32_0 : i32, i32
  }
  func.func @transform_2(%arg0: i32) -> (i32, i32) {
    %c0_i32 = arith.constant 0 : i32
    %c0_i32_0 = arith.constant 0 : i32
    %c0_i32_1 = arith.constant 0 : i32
    return %c0_i32, %c0_i32_0 : i32, i32
  }
  func.func @transform_3(%arg0: i32) -> (i32, i32) {
    %c0_i32 = arith.constant 0 : i32
    %c0_i32_0 = arith.constant 0 : i32
    %c0_i32_1 = arith.constant 0 : i32
    return %c0_i32, %c0_i32_0 : i32, i32
  }
  func.func @transform_4(%arg0: i32) -> (i32, i32) {
    %c0_i32 = arith.constant 0 : i32
    %c0_i32_0 = arith.constant 0 : i32
    %c0_i32_1 = arith.constant 0 : i32
    return %c0_i32, %c0_i32_0 : i32, i32
  }
  func.func @transform_5(%arg0: i32) -> (i32, i32) {
    %c0_i32 = arith.constant 0 : i32
    %c0_i32_0 = arith.constant 0 : i32
    %c0_i32_1 = arith.constant 0 : i32
    return %c0_i32, %c0_i32_0 : i32, i32
  }
  func.func @transform_6(%arg0: i32) -> (i32, i32) {
    %c0_i32 = arith.constant 0 : i32
    %c0_i32_0 = arith.constant 0 : i32
    %c0_i32_1 = arith.constant 0 : i32
    return %c0_i32, %c0_i32_0 : i32, i32
  }
  func.func @transform_7(%arg0: i32) -> (i32, i32) {
    %c0_i32 = arith.constant 0 : i32
    %c0_i32_0 = arith.constant 0 : i32
    return %arg0, %c0_i32 : i32, i32
  }
}

module attributes {stable_mosaic.version = 11 : i64} {
  func.func @kernel(%arg0: i32, %arg1: memref<2x128xf32, #tpu.memory_space<vmem>>, %arg2: memref<1x128xf32, #tpu.memory_space<vmem>>, %arg3: memref<1x128xf32, #tpu.memory_space<vmem>>, %arg4: memref<128x128xbf16, #tpu.memory_space<vmem>>, %arg5: memref<1x128xf32, #tpu.memory_space<vmem>>, %arg6: memref<2x128xf32, #tpu.memory_space<vmem>>) attributes {dimension_semantics = [#tpu.dimension_semantics<parallel>], iteration_bounds = array<i64: 1>, scalar_prefetch = 0 : i64, scratch_operands = 0 : i64, tpu.core_type = #tpu.core_type<tc>, window_params = [{transform_indices = @transform_0, window_bounds = array<i64: 2, 128>}, {pipeline_mode = #tpu.pipeline_mode<synchronous>, transform_indices = @transform_1, window_bounds = array<i64: 1, 128>}, {pipeline_mode = #tpu.pipeline_mode<synchronous>, transform_indices = @transform_2, window_bounds = array<i64: 1, 128>}, {pipeline_mode = #tpu.pipeline_mode<synchronous>, transform_indices = @transform_3, window_bounds = array<i64: 128, 128>}, {pipeline_mode = #tpu.pipeline_mode<synchronous>, transform_indices = @transform_4, window_bounds = array<i64: 1, 128>}, {transform_indices = @transform_5, window_bounds = array<i64: 2, 128>}]} {
    %c0 = arith.constant 0 : index
    %c0_0 = arith.constant 0 : index
    %0 = vector.load %arg1[%c0, %c0_0] : memref<2x128xf32, #tpu.memory_space<vmem>>, vector<2x128xf32>
    %c0_1 = arith.constant 0 : index
    %c0_2 = arith.constant 0 : index
    %1 = vector.load %arg2[%c0_1, %c0_2] : memref<1x128xf32, #tpu.memory_space<vmem>>, vector<1x128xf32>
    %c0_3 = arith.constant 0 : index
    %c0_4 = arith.constant 0 : index
    %2 = vector.load %arg3[%c0_3, %c0_4] : memref<1x128xf32, #tpu.memory_space<vmem>>, vector<1x128xf32>
    %cst = arith.constant dense<0.000000e+00> : vector<2xf32>
    %3 = vector.multi_reduction <add>, %0, %cst [1] : vector<2x128xf32> to vector<2xf32>
    %4 = vector.shape_cast %3 : vector<2xf32> to vector<2x1xf32>
    %cst_5 = arith.constant 1.280000e+02 : f32
    %5 = vector.broadcast %cst_5 : f32 to vector<2x1xf32>
    %6 = arith.divf %4, %5 : vector<2x1xf32>
    %7 = vector.broadcast %6 : vector<2x1xf32> to vector<2x128xf32>
    %8 = arith.subf %0, %7 : vector<2x128xf32>
    %9 = arith.mulf %8, %8 : vector<2x128xf32>
    %cst_6 = arith.constant dense<0.000000e+00> : vector<2xf32>
    %10 = vector.multi_reduction <add>, %9, %cst_6 [1] : vector<2x128xf32> to vector<2xf32>
    %11 = vector.shape_cast %10 : vector<2xf32> to vector<2x1xf32>
    %cst_7 = arith.constant 1.280000e+02 : f32
    %12 = vector.broadcast %cst_7 : f32 to vector<2x1xf32>
    %13 = arith.divf %11, %12 : vector<2x1xf32>
    %14 = vector.broadcast %6 : vector<2x1xf32> to vector<2x128xf32>
    %15 = arith.subf %0, %14 : vector<2x128xf32>
    %cst_8 = arith.constant 9.99999974E-6 : f32
    %16 = vector.broadcast %cst_8 : f32 to vector<2x1xf32>
    %17 = arith.addf %13, %16 : vector<2x1xf32>
    %18 = math.rsqrt %17 : vector<2x1xf32>
    %19 = vector.broadcast %18 : vector<2x1xf32> to vector<2x128xf32>
    %20 = arith.mulf %15, %19 : vector<2x128xf32>
    %21 = vector.broadcast %1 : vector<1x128xf32> to vector<2x128xf32>
    %22 = arith.mulf %20, %21 : vector<2x128xf32>
    %23 = vector.broadcast %2 : vector<1x128xf32> to vector<2x128xf32>
    %24 = arith.addf %22, %23 : vector<2x128xf32>
    %c0_9 = arith.constant 0 : index
    %c0_10 = arith.constant 0 : index
    %25 = vector.load %arg4[%c0_9, %c0_10] : memref<128x128xbf16, #tpu.memory_space<vmem>>, vector<128x128xbf16>
    %26 = arith.truncf %24 : vector<2x128xf32> to vector<2x128xbf16>
    %cst_11 = arith.constant dense<0.000000e+00> : vector<2x128xf32>
    %27 = tpu.matmul %26, %25, %cst_11 {dimension_numbers = #tpu.dot_dimension_numbers<[1], [0], [0], [1], [0, 0, 1, 1], [], []>} : vector<2x128xbf16>, vector<128x128xbf16>, vector<2x128xf32> -> vector<2x128xf32>
    %c0_12 = arith.constant 0 : index
    %c0_13 = arith.constant 0 : index
    %28 = vector.load %arg5[%c0_12, %c0_13] : memref<1x128xf32, #tpu.memory_space<vmem>>, vector<1x128xf32>
    %29 = vector.broadcast %28 : vector<1x128xf32> to vector<2x128xf32>
    %30 = arith.addf %27, %29 : vector<2x128xf32>
    %c0_14 = arith.constant 0 : index
    %c0_15 = arith.constant 0 : index
    %31 = vector.load %arg6[%c0_14, %c0_15] : memref<2x128xf32, #tpu.memory_space<vmem>>, vector<2x128xf32>
    tpu.vector_store %arg6[%c0_14, %c0_15], %30 {strides = array<i32>} : memref<2x128xf32, #tpu.memory_space<vmem>>, vector<2x128xf32>,
    return
  }
  func.func @transform_0(%arg0: i32) -> (i32, i32) {
    %c0_i32 = arith.constant 0 : i32
    %c0_i32_0 = arith.constant 0 : i32
    return %arg0, %c0_i32 : i32, i32
  }
  func.func @transform_1(%arg0: i32) -> (i32, i32) {
    %c0_i32 = arith.constant 0 : i32
    %c0_i32_0 = arith.constant 0 : i32
    %c0_i32_1 = arith.constant 0 : i32
    return %c0_i32, %c0_i32_0 : i32, i32
  }
  func.func @transform_2(%arg0: i32) -> (i32, i32) {
    %c0_i32 = arith.constant 0 : i32
    %c0_i32_0 = arith.constant 0 : i32
    %c0_i32_1 = arith.constant 0 : i32
    return %c0_i32, %c0_i32_0 : i32, i32
  }
  func.func @transform_3(%arg0: i32) -> (i32, i32) {
    %c0_i32 = arith.constant 0 : i32
    %c0_i32_0 = arith.constant 0 : i32
    %c0_i32_1 = arith.constant 0 : i32
    return %c0_i32, %c0_i32_0 : i32, i32
  }
  func.func @transform_4(%arg0: i32) -> (i32, i32) {
    %c0_i32 = arith.constant 0 : i32
    %c0_i32_0 = arith.constant 0 : i32
    %c0_i32_1 = arith.constant 0 : i32
    return %c0_i32, %c0_i32_0 : i32, i32
  }
  func.func @transform_5(%arg0: i32) -> (i32, i32) {
    %c0_i32 = arith.constant 0 : i32
    %c0_i32_0 = arith.constant 0 : i32
    return %arg0, %c0_i32 : i32, i32
  }
}

</mosaic_0001>

<bundles_post_ra>
// kernel: vit_forward.6
= control target key start
LH: loop header
LB: loop body
LE: loop exit
PB: predicated region body
PF: predicated region fallthrough
CT: control target
= control target key end

     0   :  { %vm37_vm0 = vcmask 523264   ;;  %v456_v16 = vmov 0   ;;  %s658_s0 = inlined_call_operand.vmem [shape: f32[32,192], index: 0, kind: input, shape index: {}]   ;;  %s659_s3 = inlined_call_operand.vmem [shape: bf16[192,128], index: 3, kind: input, shape index: {}]   ;;  %s660_s1 = inlined_call_operand.vmem [shape: f32[1,192], index: 1, kind: input, shape index: {}]   ;;  %s661_s2 = inlined_call_operand.vmem [shape: f32[1,192], index: 2, kind: input, shape index: {}]   ;;  %s662_s4 = inlined_call_operand.vmem [shape: f32[1,128], index: 4, kind: input, shape index: {}]   ;;  %s663_s5 = inlined_call_operand.vmem [shape: f32[1,128], index: 5, kind: input, shape index: {}]   ;;  %s664_s6 = inlined_call_operand.vmem [shape: f32[1,128], index: 6, kind: input, shape index: {}]   ;;  %s665_s7 = inlined_call_operand.vmem [shape: f32[32,128], index: 7, kind: output, shape index: {}]  }
   0x1   :  { %v27_v0 = vld [vmem:[%s658_s0] sm:$0xff]  ;;  %v28_v1 = vld [vmem:[%s658_s0 + $0x8] sm:$0xff]  ;;  %v29_v5 = vld [vmem:[%s658_s0 + $0x10] sm:$0xff]  ;;  %262 = vmatprep.subr.bf16.mxu0 %v456_v16  ;;  %403 = vmatprep.subr.bf16.mxu1 %v456_v16 }
   0x2   :  { %v31_v2 = vld [vmem:[%s658_s0 + $0x20] sm:$0xff]  ;;  %v38_v3 = vsel %vm37_vm0, %v28_v1, 0.0  ;;  %v32_v4 = vld [vmem:[%s658_s0 + $0x28] sm:$0xff]  ;;  %v30_v6 = vld [vmem:[%s658_s0 + $0x18] sm:$0xff] }
   0x3   :  { %v39_v7 = vadd.f32 %v38_v3, %v27_v0  ;;  %v46_v8 = vsel %vm37_vm0, %v32_v4, 0.0  ;;  %v42_v9 = vsel %vm37_vm0, %v30_v6, 0.0  ;;  %v33_v10 = vld [vmem:[%s658_s0 + $0x30] sm:$0xff]  ;;  %v34_v11 = vld [vmem:[%s658_s0 + $0x38] sm:$0xff]  ;;  %v428_v17 = vld [vmem:[%s659_s3] sm:$0xff]  }
   0x4   :  { %v47_v12 = vadd.f32 %v46_v8, %v31_v2  ;;  %v50_v13 = vsel %vm37_vm0, %v34_v11, 0.0  ;;  %v43_v14 = vadd.f32 %v42_v9, %v29_v5  ;;  %263 = vmatpush1.bf16.msra.mxu0 %v428_v17  ;;  %415 = vmatpush1.bf16.msra.mxu1 %v428_v17  ;;  %v429_v18 = vld [vmem:[%s659_s3 + $0x8] sm:$0xff]   ;;  %v430_v19 = vld [vmem:[%s659_s3 + $0x10] sm:$0xff]   ;;  %v431_v20 = vld [vmem:[%s659_s3 + $0x18] sm:$0xff]  }
   0x5   :  { %40 = vadd.xlane.f32.xlu0 %v39_v7  ;;  %v51_v15 = vadd.f32 %v50_v13, %v33_v10  ;;  %264 = vmatprep.subr.bf16.mxu0 %v456_v16  ;;  %v432_v21 = vld [vmem:[%s659_s3 + $0x20] sm:$0xff]   ;;  %v433_v54 = vld [vmem:[%s659_s3 + $0x28] sm:$0xff]   ;;  %v434_v55 = vld [vmem:[%s659_s3 + $0x30] sm:$0xff]  }
   0x6   :  { %48 = vadd.xlane.f32.xlu1 %v47_v12  ;;  %404 = vmatprep.subr.bf16.mxu1 %v456_v16  ;;  %v435_v56 = vld [vmem:[%s659_s3 + $0x38] sm:$0xff]   ;;  %v436_v57 = vld [vmem:[%s659_s3 + $0x40] sm:$0xff]   ;;  %v437_v58 = vld [vmem:[%s659_s3 + $0x48] sm:$0xff]  }
   0x7   :  { %v438_v59 = vld [vmem:[%s659_s3 + $0x50] sm:$0xff]   ;;  %v439_v60 = vld [vmem:[%s659_s3 + $0x58] sm:$0xff]   ;;  %v35_v13 = vld [vmem:[%s660_s1] sm:$0x3] }
   0x8   :  { %265 = vmatpush1.bf16.msra.mxu0 %v429_v18  ;;  %416 = vmatpush1.bf16.msra.mxu1 %v429_v18  ;;  %v36_v17 = vld [vmem:[%s661_s2] sm:$0x3] }
   0x9   :  { %44 = vadd.xlane.f32.xlu0 %v43_v14  ;;  %266 = vmatprep.subr.bf16.mxu0 %v456_v16 }
   0xa   :  { %52 = vadd.xlane.f32.xlu1 %v51_v15  ;;  %405 = vmatprep.subr.bf16.mxu1 %v456_v16 }
   0xc   :  { %267 = vmatpush1.bf16.msra.mxu0 %v430_v19  ;;  %417 = vmatpush1.bf16.msra.mxu1 %v430_v19 }
   0xd   :  { %268 = vmatprep.subr.bf16.mxu0 %v456_v16  ;;  %406 = vmatprep.subr.bf16.mxu1 %v456_v16 }
  0x10   :  { %269 = vmatpush1.bf16.msra.mxu0 %v431_v20  ;;  %418 = vmatpush1.bf16.msra.mxu1 %v431_v20 }
  0x11   :  { %270 = vmatprep.subr.bf16.mxu0 %v456_v16  ;;  %407 = vmatprep.subr.bf16.mxu1 %v456_v16 }
  0x14   :  { %271 = vmatpush1.bf16.msra.mxu0 %v432_v21  ;;  %419 = vmatpush1.bf16.msra.mxu1 %v432_v21 }
  0x15   :  { %272 = vmatprep.subr.bf16.mxu0 %v456_v16  ;;  %408 = vmatprep.subr.bf16.mxu1 %v456_v16 }
  0x18   :  { %273 = vmatpush1.bf16.msra.mxu0 %v433_v54  ;;  %420 = vmatpush1.bf16.msra.mxu1 %v433_v54 }
  0x19   :  { %274 = vmatprep.subr.bf16.mxu0 %v456_v16  ;;  %409 = vmatprep.subr.bf16.mxu1 %v456_v16 }
  0x1c   :  { %275 = vmatpush1.bf16.msra.mxu0 %v434_v55  ;;  %421 = vmatpush1.bf16.msra.mxu1 %v434_v55 }
  0x1d   :  { %276 = vmatprep.subr.bf16.mxu0 %v456_v16  ;;  %410 = vmatprep.subr.bf16.mxu1 %v456_v16 }
  0x20   :  { %277 = vmatpush1.bf16.msra.mxu0 %v435_v56  ;;  %422 = vmatpush1.bf16.msra.mxu1 %v435_v56 }
  0x21   :  { %278 = vmatprep.subr.bf16.mxu0 %v456_v16  ;;  %411 = vmatprep.subr.bf16.mxu1 %v456_v16 }
  0x24   :  { %279 = vmatpush1.bf16.msra.mxu0 %v436_v57  ;;  %423 = vmatpush1.bf16.msra.mxu1 %v436_v57 }
  0x25   :  { %280 = vmatprep.subr.bf16.mxu0 %v456_v16  ;;  %412 = vmatprep.subr.bf16.mxu1 %v456_v16 }
  0x28   :  { %281 = vmatpush1.bf16.msra.mxu0 %v437_v58  ;;  %424 = vmatpush1.bf16.msra.mxu1 %v437_v58 }
  0x29   :  { %282 = vmatprep.subr.bf16.mxu0 %v456_v16  ;;  %413 = vmatprep.subr.bf16.mxu1 %v456_v16 }
  0x2c   :  { %283 = vmatpush1.bf16.msra.mxu0 %v438_v59  ;;  %425 = vmatpush1.bf16.msra.mxu1 %v438_v59 }
  0x2d   :  { %284 = vmatprep.subr.bf16.mxu0 %v456_v16  ;;  %414 = vmatprep.subr.bf16.mxu1 %v456_v16 }
  0x30   :  { %285 = vmatpush1.bf16.msra.mxu0 %v439_v60  ;;  %426 = vmatpush1.bf16.msra.mxu1 %v439_v60 }
  0x92   :  { %v41_v22 = vpop.xlane.xlu0 %40 }
  0x93   :  { %v55_v23 = vmul.f32 0.0052083335, %v41_v22  ;;  %v49_v24 = vpop.xlane.xlu1 %48 }
  0x94   :  { %v57_v25 = vmul.f32 0.0052083335, %v49_v24 }
  0x95   :  { %v552_v26 = vsub.f32 %v27_v0, %v55_v23  ;;  %v554_v27 = vsub.f32 %v28_v1, %v55_v23  ;;  %v112_v0 = vlaneseq }
  0x96   :  { %v556_v28 = vsub.f32 %v31_v2, %v57_v25  ;;  %v558_v29 = vsub.f32 %v32_v4, %v57_v25  ;;  %v45_v30 = vpop.xlane.xlu0 %44 }
  0x97   :  { %v56_v31 = vmul.f32 0.0052083335, %v45_v30  ;;  %v53_v32 = vpop.xlane.xlu1 %52  ;;  %v67_v33 = vmul.f32 %v552_v26, %v552_v26  ;;  %v68_v34 = vmul.f32 %v554_v27, %v554_v27  ;;  %v113_v7 = vshrl.u32 %v112_v0, 7 }
  0x98   :  { %v58_v35 = vmul.f32 0.0052083335, %v53_v32  ;;  %v71_v36 = vmul.f32 %v556_v28, %v556_v28  ;;  %v72_v37 = vmul.f32 %v558_v29, %v558_v29 }
  0x99   :  { %v568_v38 = vsub.f32 %v29_v5, %v56_v31  ;;  %v570_v39 = vsub.f32 %v30_v6, %v56_v31  ;;  %v75_v40 = vsel %vm37_vm0, %v68_v34, 0.0  ;;  %v118_v12 = vsub.s32 1, %v113_v7 }
  0x9a   :  { %v573_v41 = vsub.f32 %v33_v10, %v58_v35  ;;  %v575_v42 = vsub.f32 %v34_v11, %v58_v35  ;;  %v76_v43 = vadd.f32 %v75_v40, %v67_v33  ;;  %v83_v44 = vsel %vm37_vm0, %v72_v37, 0.0 }
  0x9b   :  { %v69_v45 = vmul.f32 %v568_v38, %v568_v38  ;;  %v70_v46 = vmul.f32 %v570_v39, %v570_v39  ;;  %v84_v47 = vadd.f32 %v83_v44, %v71_v36  ;;  %v114_v11 = vsub.s32 0, %v113_v7 }
  0x9c   :  { %77 = vadd.xlane.f32.xlu0 %v76_v43  ;;  %v73_v48 = vmul.f32 %v573_v41, %v573_v41  ;;  %v74_v49 = vmul.f32 %v575_v42, %v575_v42  ;;  %v119_v16 = vrot.slane %v35_v13, %v118_v12  ;;  %v138_v23 = vrot.slane %v36_v17, %v118_v12 }
  0x9d   :  { %v79_v50 = vsel %vm37_vm0, %v70_v46, 0.0  ;;  %v115_v15 = vrot.slane %v35_v13, %v114_v11  ;;  %v134_v22 = vrot.slane %v36_v17, %v114_v11 }
  0x9e   :  { %v80_v51 = vadd.f32 %v79_v50, %v69_v45  ;;  %v87_v52 = vsel %vm37_vm0, %v74_v49, 0.0 }
  0x9f   :  { %v88_v53 = vadd.f32 %v87_v52, %v73_v48 }
  0xa0   :  { %85 = vadd.xlane.f32.xlu0 %v84_v47  ;;  %81 = vadd.xlane.f32.xlu1 %v80_v51 }
  0xa4   :  { %89 = vadd.xlane.f32.xlu1 %v88_v53 }
 0x129   :  { %v78_v61 = vpop.xlane.xlu0 %77 }
 0x12a   :  { %v91_v62 = vmul.f32 0.0052083335, %v78_v61 }
 0x12c   :  { %v95_v63 = vadd.f32 1e-05, %v91_v62 }
 0x12d   :  { %v82_v1 = vpop.xlane.xlu1 %81  ;;  %v86_v2 = vpop.xlane.xlu0 %85 }
 0x12e   :  { %440 = vrsqrt.f32 %v95_v63  ;;  %v92_v3 = vmul.f32 0.0052083335, %v82_v1  ;;  %v93_v4 = vmul.f32 0.0052083335, %v86_v2 }
 0x130   :  { %v96_v5 = vadd.f32 1e-05, %v92_v3  ;;  %v97_v6 = vadd.f32 1e-05, %v93_v4 }
 0x131   :  { %v90_v8 = vpop.xlane.xlu1 %89 }
 0x132   :  { %442 = vrsqrt.f32 %v96_v5  ;;  %v94_v9 = vmul.f32 0.0052083335, %v90_v8 }
 0x133   :  { %444 = vrsqrt.f32 %v97_v6 }
 0x134   :  { %v98_v10 = vadd.f32 1e-05, %v94_v9 }
 0x136   :  { %446 = vrsqrt.f32 %v98_v10 }
 0x138   :  { %v441_v14 = vpop.eup %440 }
 0x139   :  { %v104_v18 = vmul.f32 %v441_v14, %v554_v27  ;;  %v103_v19 = vmul.f32 %v441_v14, %v552_v26 }
 0x13b   :  { %v123_v21 = vmul.f32 %v119_v16, %v104_v18  ;;  %v122_v24 = vmul.f32 %v115_v15, %v103_v19 }
 0x13c   :  { %v443_v20 = vpop.eup %442 }
 0x13d   :  { %v445_v25 = vpop.eup %444  ;;  %v106_v30 = vmul.f32 %v443_v20, %v570_v39  ;;  %v105_v31 = vmul.f32 %v443_v20, %v568_v38  ;;  %v142_v27 = vadd.f32 %v138_v23, %v123_v21  ;;  %v141_v37 = vadd.f32 %v134_v22, %v122_v24 }
 0x13e   :  { %v108_v32 = vmul.f32 %v445_v25, %v558_v29  ;;  %v107_v33 = vmul.f32 %v445_v25, %v556_v28 }
 0x13f   :  { %v125_v34 = vmul.f32 %v119_v16, %v106_v30  ;;  %v124_v35 = vmul.f32 %v115_v15, %v105_v31 }
 0x140   :  { %v447_v36 = vpop.eup %446  ;;  %v127_v26 = vmul.f32 %v119_v16, %v108_v32  ;;  %v126_v40 = vmul.f32 %v115_v15, %v107_v33  ;;  %v401_v33 = vld [vmem:[%s663_s5] ss:$0 sm:$0xff] }
 0x141   :  { %v144_v43 = vadd.f32 %v138_v23, %v125_v34  ;;  %v143_v44 = vadd.f32 %v134_v22, %v124_v35  ;;  %v110_v45 = vmul.f32 %v447_v36, %v575_v42  ;;  %v109_v46 = vmul.f32 %v447_v36, %v573_v41  ;;  %v386_v41 = vld [vmem:[%s662_s4] ss:$0 sm:$0xff] }
 0x142   :  { %v146_v28 = vadd.f32 %v138_v23, %v127_v26  ;;  %v145_v49 = vadd.f32 %v134_v22, %v126_v40  ;;  %v402_v36 = vld [vmem:[%s664_s6] ss:$0 sm:$0xff] }
 0x143   :  { %v174_v39 = vpack.c.bf16 %v144_v43, %v142_v27  ;;  %v173_v47 = vpack.c.bf16 %v143_v44, %v141_v37  ;;  %v129_v38 = vmul.f32 %v119_v16, %v110_v45  ;;  %v128_v48 = vmul.f32 %v115_v15, %v109_v46 }
 0x145   :  { %399 = vmatprep.mubr.msk.bf16.mxu0 %vm37_vm0, %v174_v39  ;;  %v148_v29 = vadd.f32 %v138_v23, %v129_v38  ;;  %v147_v50 = vadd.f32 %v134_v22, %v128_v48 }
 0x146   :  { %295 = vmatmul.mubr.bf16.vlgmr.msra.gmra.mrb[0].mxu0 %v173_v47 }
 0x147   :  { %v176_v51 = vpack.c.bf16 %v148_v29, %v146_v28  ;;  %v175_v52 = vpack.c.bf16 %v147_v50, %v145_v49 }
 0x149   :  { %400 = vmatprep.mubr.msk.bf16.mxu1 %vm37_vm0, %v176_v51 }
 0x14a   :  { %303 = vmatmul.mubr.bf16.vlgmr.msra.gmra.mrb[0].mxu1 %v175_v52 }
 0x219   :  { %v296_v42 = vpop.f32.mrb[0].mxu0 }
 0x21a   :  { %v297_v53 = vadd.f32 %v386_v41, %v296_v42  ;;  %v298_v54 = vpop.f32.mrb[1].mxu0 }
 0x21b   :  { %v299_v55 = vpop.f32.mrb[2].mxu0 }
 0x21c   :  { %v300_v56 = vadd.f32 %v386_v41, %v299_v55  ;;  %v301_v57 = vpop.f32.mrb[3].mxu0  ;;  %313 = vadd.xlane.f32.xlu0 %v297_v53 }
 0x21d   :  { %v304_v58 = vpop.f32.mrb[0].mxu1 }
 0x21e   :  { %v305_v59 = vadd.f32 %v386_v41, %v304_v58  ;;  %315 = vadd.xlane.f32.xlu1 %v300_v56  ;;  %v306_v60 = vpop.f32.mrb[1].mxu1 }
 0x21f   :  { %v307_v61 = vpop.f32.mrb[2].mxu1 }
 0x220   :  { %v308_v62 = vadd.f32 %v386_v41, %v307_v61  ;;  %v309_v63 = vpop.f32.mrb[3].mxu1  ;;  %317 = vadd.xlane.f32.xlu0 %v305_v59 }
 0x222   :  { %319 = vadd.xlane.f32.xlu1 %v308_v62 }
 0x2a9   :  { %v314_v0 = vpop.xlane.xlu0 %313 }
 0x2aa   :  { %v322_v1 = vmul.f32 0.0078125, %v314_v0 }
 0x2ab   :  { %v316_v2 = vpop.xlane.xlu1 %315 }
 0x2ac   :  { %v326_v3 = vsub.f32 %v297_v53, %v322_v1  ;;  %v323_v4 = vmul.f32 0.0078125, %v316_v2 }
 0x2ad   :  { %v318_v5 = vpop.xlane.xlu0 %317 }
 0x2ae   :  { %v327_v6 = vsub.f32 %v300_v56, %v323_v4  ;;  %v324_v7 = vmul.f32 0.0078125, %v318_v5  ;;  %v330_v8 = vmul.f32 %v326_v3, %v326_v3 }
 0x2af   :  { %v320_v9 = vpop.xlane.xlu1 %319 }
 0x2b0   :  { %v328_v10 = vsub.f32 %v305_v59, %v324_v7  ;;  %v325_v11 = vmul.f32 0.0078125, %v320_v9  ;;  %334 = vadd.xlane.f32.xlu0 %v330_v8  ;;  %v331_v12 = vmul.f32 %v327_v6, %v327_v6 }
 0x2b2   :  { %v329_v13 = vsub.f32 %v308_v62, %v325_v11  ;;  %336 = vadd.xlane.f32.xlu1 %v331_v12  ;;  %v332_v14 = vmul.f32 %v328_v10, %v328_v10 }
 0x2b4   :  { %338 = vadd.xlane.f32.xlu0 %v332_v14  ;;  %v333_v15 = vmul.f32 %v329_v13, %v329_v13 }
 0x2b6   :  { %340 = vadd.xlane.f32.xlu1 %v333_v15 }
 0x33d   :  { %v335_v16 = vpop.xlane.xlu0 %334 }
 0x33e   :  { %v342_v17 = vmul.f32 0.0078125, %v335_v16 }
 0x33f   :  { %v337_v18 = vpop.xlane.xlu1 %336 }
 0x340   :  { %v346_v19 = vadd.f32 1e-05, %v342_v17  ;;  %v343_v20 = vmul.f32 0.0078125, %v337_v18 }
 0x341   :  { %v339_v21 = vpop.xlane.xlu0 %338 }
 0x342   :  { %448 = vrsqrt.f32 %v346_v19  ;;  %v347_v22 = vadd.f32 1e-05, %v343_v20  ;;  %v344_v23 = vmul.f32 0.0078125, %v339_v21 }
 0x343   :  { %v341_v24 = vpop.xlane.xlu1 %340 }
 0x344   :  { %450 = vrsqrt.f32 %v347_v22  ;;  %v348_v25 = vadd.f32 1e-05, %v344_v23  ;;  %v345_v30 = vmul.f32 0.0078125, %v341_v24 }
 0x346   :  { %452 = vrsqrt.f32 %v348_v25  ;;  %v349_v31 = vadd.f32 1e-05, %v345_v30 }
 0x348   :  { %454 = vrsqrt.f32 %v349_v31 }
 0x34c   :  { %v449_v32 = vpop.eup %448 }
 0x34d   :  { %v354_v34 = vmul.f32 %v449_v32, %v326_v3 }
 0x34e   :  { %v451_v35 = vpop.eup %450 }
 0x34f   :  { %v364_v27 = vmul.f32 %v401_v33, %v354_v34  ;;  %v355_v37 = vmul.f32 %v451_v35, %v327_v6 }
 0x350   :  { %v453_v26 = vpop.eup %452 }
 0x351   :  { %v374_v40 = vadd.f32 %v402_v36, %v364_v27  ;;  %v365_v43 = vmul.f32 %v401_v33, %v355_v37  ;;  %v356_v44 = vmul.f32 %v453_v26, %v328_v10 }
 0x352   :  { %v455_v45 = vpop.eup %454 }
 0x353   :  { %378 = vst [vmem:[%s665_s7] sm:$0xff] %v374_v40  ;;  %v375_v46 = vadd.f32 %v402_v36, %v365_v43  ;;  %v366_v39 = vmul.f32 %v401_v33, %v356_v44  ;;  %v357_v47 = vmul.f32 %v455_v45, %v329_v13 }
 0x355   :  { %379 = vst [vmem:[%s665_s7 + $0x8] sm:$0xff] %v375_v46  ;;  %v376_v38 = vadd.f32 %v402_v36, %v366_v39  ;;  %v367_v48 = vmul.f32 %v401_v33, %v357_v47 }
 0x357   :  { %380 = vst [vmem:[%s665_s7 + $0x10] sm:$0xff] %v376_v38  ;;  %v377_v28 = vadd.f32 %v402_v36, %v367_v48 }
 0x359   :  { %381 = vst [vmem:[%s665_s7 + $0x18] sm:$0xff] %v377_v28 }

// kernel: vit_forward.7
= control target key start
LH: loop header
LB: loop body
LE: loop exit
PB: predicated region body
PF: predicated region fallthrough
CT: control target
= control target key end

     0   :  { %s1866_s21 = smov 0   ;;  %s2185_s0 = inlined_call_operand.vmem [shape: f32[2,17,128], index: 0, kind: input, shape index: {}]   ;;  %s2186_s1 = inlined_call_operand.vmem [shape: f32[1,128], index: 1, kind: input, shape index: {}]   ;;  %s2187_s2 = inlined_call_operand.vmem [shape: f32[1,128], index: 2, kind: input, shape index: {}]   ;;  %s2188_s3 = inlined_call_operand.vmem [shape: bf16[128,384], index: 3, kind: input, shape index: {}]   ;;  %s2189_s4 = inlined_call_operand.vmem [shape: bf16[128,128], index: 4, kind: input, shape index: {}]   ;;  %s2190_s5 = inlined_call_operand.vmem [shape: f32[1,128], index: 5, kind: input, shape index: {}]   ;;  %s2191_s6 = inlined_call_operand.vmem [shape: f32[2,17,128], index: 6, kind: output, shape index: {}]  }
   0x1 LB: > { %s1470_s22 = sadd.s32 4294967295, %s1825_s21   ;;  %p1474_p0 = scmp.ge.s32.totalorder %s1825_s21, 1  ;;  %s1825_s21 = sphi %s1866_s21, %s16_s21  }
   0x2   : > { %p212_p1 = scmp.lt.s32.totalorder %s1825_s21, 3 }
   0x4   : > { %p213_p2 = pnand %p1474_p0, %p212_p1 }
   0x5   : > { %p242_p3 = scmp.lt.s32.totalorder (!%p213_p2), %s1470_s22, 1  ;;  %vm262_vm0 = vcmask (!%p213_p2), 1040384   ;;  %v1722_v4 = vld [vmem:[%s2188_s3 + $0x4] ss:$12 sps:$4 sm:$0xff] (!%p213_p2)   ;;  %v1724_v5 = vld [vmem:[%s2188_s3] ss:$12 sps:$4 sm:$0xff] (!%p213_p2)  }
   0x6   : > { %216 = sbr.rel (%p213_p2) target bundleno = 2781 (0xadd), region = 44  ;;  %v1725_v6 = vld [vmem:[%s2188_s3 + $0x8] ss:$12 sps:$4 sm:$0xff] (!%p213_p2)   ;;  %475 = vmatprep.subr.bf16.mxu0 (!%p213_p2), %v1722_v4  ;;  %v1728_v21 = vld [vmem:[%s2188_s3 + $0x18] ss:$12 sps:$4 sm:$0xff] (!%p213_p2)   ;;  %v1827_v37 = vmov (!%p213_p2), 0  }
   0x7   : > { %v1726_v7 = vld [vmem:[%s2188_s3 + $0x1c] ss:$12 sps:$4 sm:$0xff] (!%p213_p2)   ;;  %1582 = vmatprep.subr.bf16.mxu1 (!%p213_p2), %v1725_v6  ;;  %476 = vmatpush1.bf16.msra.mxu0 (!%p213_p2), %v1724_v5  ;;  %v1729_v22 = vld [vmem:[%s2188_s3 + $0x20] ss:$12 sps:$4 sm:$0xff] (!%p213_p2)   ;;  %v1733_v25 = vld [vmem:[%s2188_s3 + $0x38] ss:$12 sps:$4 sm:$0xff] (!%p213_p2)  }
   0x8   : > { %1583 = vmatpush3.bf16.msra.mxu1 (!%p213_p2), %v1725_v6  ;;  %477 = vmatprep.subr.bf16.mxu0 (!%p213_p2), %v1726_v7  ;;  %v1730_v23 = vld [vmem:[%s2188_s3 + $0x34] ss:$12 sps:$4 sm:$0xff] (!%p213_p2)   ;;  %v1732_v24 = vld [vmem:[%s2188_s3 + $0x30] ss:$12 sps:$4 sm:$0xff] (!%p213_p2)   ;;  %v1734_v26 = vld [vmem:[%s2188_s3 + $0x4c] ss:$12 sps:$4 sm:$0xff] (!%p213_p2)  }
   0x9   : > { %1584 = vmatprep.subr.bf16.mxu1 (!%p213_p2), %v1729_v22  ;;  %v1736_v27 = vld [vmem:[%s2188_s3 + $0x48] ss:$12 sps:$4 sm:$0xff] (!%p213_p2)   ;;  %v1737_v28 = vld [vmem:[%s2188_s3 + $0x50] ss:$12 sps:$4 sm:$0xff] (!%p213_p2)   ;;  %v1740_v30 = vld [vmem:[%s2188_s3 + $0x60] ss:$12 sps:$4 sm:$0xff] (!%p213_p2)   ;;  %507 = vmatprep.mubr.bf16.mxu0 (!%p213_p2), %v1827_v37 }
   0xa   : > { %v1738_v29 = vld [vmem:[%s2188_s3 + $0x64] ss:$12 sps:$4 sm:$0xff] (!%p213_p2)   ;;  %v1741_v31 = vld [vmem:[%s2188_s3 + $0x68] ss:$12 sps:$4 sm:$0xff] (!%p213_p2)   ;;  %v1745_v33 = vld [vmem:[%s2188_s3 + $0x80] ss:$12 sps:$4 sm:$0xff] (!%p213_p2)  }
   0xb   : > { %478 = vmatpush1.bf16.msra.mxu0 (!%p213_p2), %v1728_v21  ;;  %v1742_v32 = vld [vmem:[%s2188_s3 + $0x7c] ss:$12 sps:$4 sm:$0xff] (!%p213_p2)   ;;  %v1744_v34 = vld [vmem:[%s2188_s3 + $0x78] ss:$12 sps:$4 sm:$0xff] (!%p213_p2)   ;;  %v1746_v35 = vld [vmem:[%s2188_s3 + $0x94] ss:$12 sps:$4 sm:$0xff] (!%p213_p2)  }
   0xc   : > { %1585 = vmatpush3.bf16.msra.mxu1 (!%p213_p2), %v1729_v22  ;;  %479 = vmatprep.subr.bf16.mxu0 (!%p213_p2), %v1730_v23  ;;  %v1749_v36 = vld [vmem:[%s2188_s3 + $0x98] ss:$12 sps:$4 sm:$0xff] (!%p213_p2)   ;;  %v1748_v38 = vld [vmem:[%s2188_s3 + $0x90] ss:$12 sps:$4 sm:$0xff] (!%p213_p2)   ;;  %v1752_v41 = vld [vmem:[%s2188_s3 + $0xa8] ss:$12 sps:$4 sm:$0xff] (!%p213_p2)  }
   0xd   : > { %s2193_s22 = smov (!%p242_p3, %s1470_s22), 1  ;;  %1586 = vmatprep.subr.bf16.mxu1 %v1733_v25  ;;  %v1750_v39 = vld [vmem:[%s2188_s3 + $0xac] ss:$12 sps:$4 sm:$0xff]   ;;  %v1753_v40 = vld [vmem:[%s2188_s3 + $0xb0] ss:$12 sps:$4 sm:$0xff]   ;;  %vm580_vm1 = vcmask 261120  }
   0xe   : > { %s1694_s23 = smul.u32 24, %s2193_s22  ;;  %v1477_v53 = vld [vmem:[%s2186_s1] ss:$0 sm:$0xff]  ;;  %vm641_vm2 = vcmask 138240   ;;  %vm648_vm3 = vcmask 131072   ;;  %s1828_s15 = smov 96  }
   0xf   : > { %480 = vmatpush1.bf16.msra.mxu0 %v1732_v24  ;;  %v1478_v59 = vld [vmem:[%s2187_s2] ss:$0 sm:$0xff]  ;;  %s1829_s16 = smov 64   ;;  %s1830_s17 = smov 32   ;;  %vm1277_vm4 = vcmask 523264   ;;  %vm1281_vm5 = vcmask 785408  }
  0x10   : > { %s1882_s26 = scalar_lea.vmem %s2185_s0, %s1694_s23  ;;  %1587 = vmatpush3.bf16.msra.mxu1 %v1733_v25  ;;  %481 = vmatprep.subr.bf16.mxu0 %v1734_v26  ;;  %s251_s18 = scalar_lea.vmem %s2191_s6, %s1694_s23 }
  0x11   : > { %v253_v0 = vld [vmem:[%s1882_s26] sm:$0xff]  ;;  %v255_v1 = vld [vmem:[%s1882_s26 + $0x10] sm:$0x1]  ;;  %v254_v2 = vld [vmem:[%s1882_s26 + $0x8] sm:$0xff]  ;;  %1588 = vmatprep.subr.bf16.mxu1 %v1737_v28 }
  0x12   : > { %258 = vadd.xlane.f32.xlu0 %v253_v0  ;;  %v263_v3 = vsel %vm262_vm0, %v255_v1, 0.0 }
  0x13   : > { %264 = vadd.xlane.f32.xlu1 %v263_v3  ;;  %482 = vmatpush1.bf16.msra.mxu0 %v1736_v27 }
  0x14   : > { %1589 = vmatpush3.bf16.msra.mxu1 %v1737_v28  ;;  %483 = vmatprep.subr.bf16.mxu0 %v1738_v29 }
  0x15   : > { %1590 = vmatprep.subr.bf16.mxu1 %v1741_v31 }
  0x16   : > { %260 = vadd.xlane.f32.xlu0 %v254_v2 }
  0x17   : > { %484 = vmatpush1.bf16.msra.mxu0 %v1740_v30 }
  0x18   : > { %1591 = vmatpush3.bf16.msra.mxu1 %v1741_v31  ;;  %485 = vmatprep.subr.bf16.mxu0 %v1742_v32 }
  0x19   : > { %1592 = vmatprep.subr.bf16.mxu1 %v1745_v33 }
  0x1b   : > { %486 = vmatpush1.bf16.msra.mxu0 %v1744_v34 }
  0x1c   : > { %1593 = vmatpush3.bf16.msra.mxu1 %v1745_v33  ;;  %487 = vmatprep.subr.bf16.mxu0 %v1746_v35 }
  0x1d   : > { %1594 = vmatprep.subr.bf16.mxu1 %v1749_v36 }
  0x1f   : > { %488 = vmatpush1.bf16.msra.mxu0 %v1748_v38 }
  0x20   : > { %1595 = vmatpush3.bf16.msra.mxu1 %v1749_v36  ;;  %489 = vmatprep.subr.bf16.mxu0 %v1750_v39 }
  0x21   : > { %1596 = vmatprep.subr.bf16.mxu1 %v1753_v40 }
  0x23   : > { %490 = vmatpush1.bf16.msra.mxu0 %v1752_v41 }
  0x24   : > { %1597 = vmatpush3.bf16.msra.mxu1 %v1753_v40 }
  0x9f   : > { %v259_v8 = vpop.xlane.xlu0 %258 }
  0xa0   : > { %v267_v9 = vmul.f32 0.0078125, %v259_v8  ;;  %v265_v10 = vpop.xlane.xlu1 %264 }
  0xa1   : > { %v269_v11 = vmul.f32 0.0078125, %v265_v10 }
  0xa2   : > { %v1900_v12 = vsub.f32 %v253_v0, %v267_v9 }
  0xa3   : > { %v1902_v13 = vsub.f32 %v255_v1, %v269_v11  ;;  %v261_v14 = vpop.xlane.xlu0 %260 }
  0xa4   : > { %v268_v15 = vmul.f32 0.0078125, %v261_v14  ;;  %v273_v16 = vmul.f32 %v1900_v12, %v1900_v12 }
  0xa5   : > { %v275_v17 = vmul.f32 %v1902_v13, %v1902_v13 }
  0xa6   : > { %v1908_v18 = vsub.f32 %v254_v2, %v268_v15  ;;  %276 = vadd.xlane.f32.xlu1 %v273_v16 }
  0xa7   : > { %v280_v19 = vsel %vm262_vm0, %v275_v17, 0.0 }
  0xa8   : > { %v274_v20 = vmul.f32 %v1908_v18, %v1908_v18 }
  0xaa   : > { %281 = vadd.xlane.f32.xlu1 %v280_v19  ;;  %278 = vadd.xlane.f32.xlu0 %v274_v20 }
 0x133   : > { %v277_v42 = vpop.xlane.xlu1 %276 }
 0x134   : > { %v283_v43 = vmul.f32 0.0078125, %v277_v42 }
 0x136   : > { %v286_v44 = vadd.f32 1e-05, %v283_v43 }
 0x137   : > { %v282_v45 = vpop.xlane.xlu1 %281  ;;  %v279_v46 = vpop.xlane.xlu0 %278 }
 0x138   : > { %1762 = vrsqrt.f32 %v286_v44  ;;  %v285_v47 = vmul.f32 0.0078125, %v282_v45  ;;  %v284_v48 = vmul.f32 0.0078125, %v279_v46 }
 0x13a   : > { %v288_v49 = vadd.f32 1e-05, %v285_v47  ;;  %v287_v50 = vadd.f32 1e-05, %v284_v48 }
 0x13c   : > { %1764 = vrsqrt.f32 %v288_v49 }
 0x13d   : > { %1766 = vrsqrt.f32 %v287_v50 }
 0x142   : > { %v1763_v51 = vpop.eup %1762 }
 0x143   : > { %v292_v52 = vmul.f32 %v1763_v51, %v1900_v12  ;;  %v1987_v12 = vsel %vm262_vm0, 65535, %v1827_v37 }
 0x145   : > { %v301_v58 = vmul.f32 %v1477_v53, %v292_v52 }
 0x146   : > { %v1765_v54 = vpop.eup %1764 }
 0x147   : > { %v1767_v55 = vpop.eup %1766  ;;  %v294_v56 = vmul.f32 %v1765_v54, %v1902_v13  ;;  %v310_v63 = vadd.f32 %v1478_v59, %v301_v58 }
 0x148   : > { %v293_v57 = vmul.f32 %v1767_v55, %v1908_v18 }
 0x149   : > { %v303_v60 = vmul.f32 %v1477_v53, %v294_v56 }
 0x14a   : > { %v302_v61 = vmul.f32 %v1477_v53, %v293_v57 }
 0x14b   : > { %v312_v62 = vadd.f32 %v1478_v59, %v303_v60 }
 0x14c   : > { %v311_v0 = vadd.f32 %v1478_v59, %v302_v61 }
 0x14d   : > { %v314_v1 = vpack.c.bf16 %v312_v62, %v312_v62 }
 0x14e   : > { %v313_v2 = vpack.c.bf16 %v311_v0, %v310_v63 }
 0x150   : > { %508 = vmatmul.mubr.bf16.vlgmr.msra.gmra.mrb[0].mxu0 %v313_v2  ;;  %1598 = vmatprep.mubr.bf16.mxu1 %v313_v2 }
 0x151   : > { %1599 = vmatmul.mubr.bf16.vlgmr.msra.gmra.mrb[0].mxu1 %v314_v1  ;;  %517 = vmatprep.mubr.bf16.mxu0 %v1827_v37 }
 0x158   : > { %518 = vmatmul.mubr.bf16.gmra.mrb[4].mxu0 %v314_v1 }
 0x223   : > { %v509_v3 = vpop.f32.mrb[0].mxu0 }
 0x224   : > { %v511_v4 = vpop.f32.mrb[1].mxu0  ;;  %v1600_v5 = vpop.f32.mrb[0].mxu1 }
 0x225   : > { %v513_v6 = vpop.f32.mrb[2].mxu0  ;;  %v560_v7 = vpop.f32.mrb[1].mxu1  ;;  %v1982_v8 = vpack.c.bf16 %v1600_v5, %v1600_v5 }
 0x226   : > { %v1984_v9 = vpack.c.bf16 %v513_v6, %v509_v3  ;;  %v515_v10 = vpop.f32.mrb[3].mxu0  ;;  %v1601_v11 = vpop.f32.mrb[2].mxu1 }
 0x227   : > { %v1989_v13 = vpack.c.bf16 %v515_v10, %v511_v4  ;;  %v563_v14 = vpop.f32.mrb[3].mxu1  ;;  %v687_v17 = vand.u32 %v1987_v12, %v1982_v8 }
 0x228   : > { %v1991_v15 = vpack.c.bf16 %v563_v14, %v560_v7  ;;  %1606 = vmatprep.mubr.msk.bf16.mxu0 %vm580_vm1, %v1984_v9 }
 0x229   : > { %1686 = vmatprep.subr.msk.bf16.mxu0 %vm580_vm1, %v1989_v13  ;;  %v588_v16 = vsel %vm580_vm1, %v1989_v13, 0 }
 0x22a   : > { %1603 = vmatpush3.bf16.xpose.msra.mxu0 %v588_v16  ;;  %1610 = vmatprep.subr.bf16.mxu1 %v1991_v15 }
 0x22b   : > { %v519_v18 = vpop.f32.mrb[4].mxu0  ;;  %1611 = vmatpush3.bf16.msra.mxu1 %v1991_v15 }
 0x22c   : > { %v521_v19 = vpop.f32.mrb[5].mxu0  ;;  %1612 = vmatprep.subr.bf16.mxu1 %v687_v17  ;;  %v2009_v24 = vpack.c.bf16 %v519_v18, %v519_v18 }
 0x22d   : > { %v2003_v20 = vpack.c.bf16 %v521_v19, %v521_v19  ;;  %v523_v21 = vpop.f32.mrb[6].mxu0 }
 0x22e   : > { %v524_v22 = vpop.f32.mrb[7].mxu0 }
 0x22f   : > { %1687 = vmatprep.subr.msk.bf16.mxu0 %vm580_vm1, %v2003_v20  ;;  %1613 = vmatpush3.bf16.msra.mxu1 %v687_v17  ;;  %v591_v23 = vsel %vm580_vm1, %v2003_v20, 0 }
 0x232   : > { %1605 = vmatpush3.bf16.xpose.msra.mxu0 %v591_v23 }
 0x239   : > { %1607 = vmatmul.mubr.msk.bf16.vlgmr.msra.gmra.mrb[8].mxu0 %vm580_vm1, %v2009_v24 }
 0x30c   : > { %v1608_v25 = vpop.f32.mrb[8].mxu0 }
 0x30d   : > { %v627_v26 = vpop.f32.mrb[9].mxu0  ;;  %v649_v31 = vsel %vm648_vm3, %v1608_v25, -inf }
 0x30e   : > { %v1609_v27 = vpop.f32.mrb[10].mxu0  ;;  %v642_v28 = vsel %vm641_vm2, %v627_v26, -inf }
 0x30f   : > { %643 = vmax.xlane.f32.xlu0 %v642_v28  ;;  %v630_v29 = vpop.f32.mrb[11].mxu0 }
 0x310   : > { %v645_v30 = vsel %vm641_vm2, %v630_v29, -inf }
 0x311   : > { %646 = vmax.xlane.f32.xlu1 %v645_v30 }
 0x313   : > { %650 = vmax.xlane.f32.xlu0 %v649_v31 }
 0x39c   : > { %v644_v32 = vpop.xlane.xlu0 %643 }
 0x39d   : > { %v652_v33 = vsub.f32 %v627_v26, %v644_v32 }
 0x39e   : > { %v647_v34 = vpop.xlane.xlu1 %646 }
 0x39f   : > { %v655_v35 = vmul.f32 1.442695, %v652_v33  ;;  %v653_v36 = vsub.f32 %v630_v29, %v647_v34 }
 0x3a0   : > { %v651_v37 = vpop.xlane.xlu0 %650 }
 0x3a1   : > { %1768 = vpow2.f32 %v655_v35  ;;  %v657_v38 = vmul.f32 1.442695, %v653_v36  ;;  %v654_v39 = vsub.f32 %v1608_v25, %v651_v37 }
 0x3a3   : > { %1770 = vpow2.f32 %v657_v38  ;;  %v659_v40 = vmul.f32 1.442695, %v654_v39 }
 0x3a5   : > { %1772 = vpow2.f32 %v659_v40 }
 0x3ab   : > { %v1769_v41 = vpop.eup %1768 }
 0x3ac   : > { %v661_v42 = vsel %vm641_vm2, %v1769_v41, 0.0 }
 0x3ad   : > { %v1771_v43 = vpop.eup %1770  ;;  %662 = vadd.xlane.f32.xlu1 %v661_v42 }
 0x3ae   : > { %v664_v44 = vsel %vm641_vm2, %v1771_v43, 0.0 }
 0x3af   : > { %v1773_v45 = vpop.eup %1772  ;;  %665 = vadd.xlane.f32.xlu0 %v664_v44 }
 0x3b0   : > { %v667_v46 = vsel %vm648_vm3, %v1773_v45, 0.0 }
 0x3b1   : > { %668 = vadd.xlane.f32.xlu1 %v667_v46 }
 0x3c2   : > { %747 = vrot.lane.b32.xlu1 %v2003_v20, %s1828_s15 }
 0x3c5   : > { %745 = vrot.lane.b32.xlu0 %v1989_v13, %s1828_s15 }
 0x3c6   : > { %739 = vrot.lane.b32.xlu1 %v1984_v9, %s1828_s15 }
 0x3c9   : > { %741 = vrot.lane.b32.xlu0 %v2009_v24, %s1828_s15 }
 0x3ca   : > { %912 = vrot.lane.b32.xlu1 %v1989_v13, %s1829_s16 }
 0x3cd   : > { %908 = vrot.lane.b32.xlu0 %v1984_v9, %s1829_s16 }
 0x3ce   : > { %914 = vrot.lane.b32.xlu1 %v2003_v20, %s1829_s16 }
 0x3d2   : > { %910 = vrot.lane.b32.xlu1 %v2009_v24, %s1829_s16 }
 0x43a   : > { %v663_v47 = vpop.xlane.xlu1 %662 }
 0x43b   : > { %1774 = vrcp.f32 %v663_v47 }
 0x43c   : > { %v666_v48 = vpop.xlane.xlu0 %665 }
 0x43d   : > { %1776 = vrcp.f32 %v666_v48 }
 0x43e   : > { %v669_v49 = vpop.xlane.xlu1 %668 }
 0x43f   : > { %1778 = vrcp.f32 %v669_v49 }
 0x440   : > { %v746_v50 = vpop.permute.xlu0 %745 }
 0x441   : > { %1688 = vmatprep.subr.msk.bf16.mxu1 %vm580_vm1, %v746_v50  ;;  %v756_v60 = vsel %vm580_vm1, %v746_v50, 0 }
 0x442   : > { %v748_v53 = vpop.permute.xlu1 %747 }
 0x443   : > { %v759_v62 = vsel %vm580_vm1, %v748_v53, 0 }
 0x444   : > { %v742_v0 = vpop.permute.xlu0 %741 }
 0x445   : > { %v1775_v51 = vpop.eup %1774 }
 0x446   : > { %v673_v54 = vmul.f32 %v1775_v51, %v1769_v41  ;;  %v740_v61 = vpop.permute.xlu1 %739 }
 0x447   : > { %v1777_v52 = vpop.eup %1776 }
 0x448   : > { %v674_v55 = vmul.f32 %v1777_v52, %v1771_v43  ;;  %v909_v1 = vpop.permute.xlu0 %908 }
 0x449   : > { %v1779_v56 = vpop.eup %1778 }
 0x44a   : > { %v675_v57 = vmul.f32 %v1779_v56, %v1773_v45  ;;  %v676_v58 = vpack.c.bf16 %v674_v55, %v673_v54  ;;  %v913_v63 = vpop.permute.xlu1 %912 }
 0x44b   : > { %v923_v2 = vsel %vm580_vm1, %v913_v63, 0 }
 0x44c   : > { %1614 = vmatprep.mubr.msk.bf16.mxu1 %vm641_vm2, %v676_v58  ;;  %v677_v59 = vpack.c.bf16 %v675_v57, %v675_v57 }
 0x44e   : > { %1615 = vmatmul.mubr.msk.bf16.vlgmr.msra.gmra.mrb[4].mxu1 %vm641_vm2, %v677_v59  ;;  %v915_v3 = vpop.permute.xlu1 %914 }
 0x44f   : > { %1619 = vmatpush3.bf16.xpose.msra.mxu1 %v756_v60  ;;  %1622 = vmatprep.mubr.msk.bf16.mxu1 %vm580_vm1, %v740_v61  ;;  %v926_v4 = vsel %vm580_vm1, %v915_v3, 0 }
 0x450   : > { %1689 = vmatprep.subr.msk.bf16.mxu1 %vm580_vm1, %v748_v53 }
 0x452   : > { %v911_v5 = vpop.permute.xlu1 %910 }
 0x457   : > { %1621 = vmatpush3.bf16.xpose.msra.mxu1 %v759_v62 }
 0x458   : > { %1690 = vmatprep.subr.msk.bf16.mxu1 %vm580_vm1, %v913_v63 }
 0x45e   : > { %1623 = vmatmul.mubr.msk.bf16.vlgmr.msra.gmra.mrb[8].mxu1 %vm580_vm1, %v742_v0 }
 0x45f   : > { %1635 = vmatpush3.bf16.xpose.msra.mxu1 %v923_v2  ;;  %1638 = vmatprep.mubr.msk.bf16.mxu1 %vm580_vm1, %v909_v1 }
 0x460   : > { %1691 = vmatprep.subr.msk.bf16.mxu1 %vm580_vm1, %v915_v3 }
 0x467   : > { %1637 = vmatpush3.bf16.xpose.msra.mxu1 %v926_v4 }
 0x46e   : > { %1639 = vmatmul.mubr.msk.bf16.vlgmr.msra.gmra.mrb[12].mxu1 %vm580_vm1, %v911_v5 }
 0x521   : > { %v2049_v6 = vpop.f32.mrb[4].mxu1 }
 0x522   : > { %v2051_v7 = vpop.f32.mrb[5].mxu1 }
 0x523   : > { %v1617_v10 = vpop.f32.mrb[6].mxu1 }
 0x524   : > { %v2053_v11 = vpop.f32.mrb[7].mxu1 }
 0x531   : > { %v2055_v14 = vpop.f32.mrb[8].mxu1 }
 0x532   : > { %v2057_v16 = vpop.f32.mrb[9].mxu1  ;;  %v815_v44 = vsel %vm648_vm3, %v2055_v14, -inf }
 0x533   : > { %v1625_v17 = vpop.f32.mrb[10].mxu1  ;;  %v809_v43 = vsel %vm641_vm2, %v2057_v16, -inf }
 0x534   : > { %v2059_v18 = vpop.f32.mrb[11].mxu1 }
 0x541   : > { %v1640_v19 = vpop.f32.mrb[12].mxu1 }
 0x542   : > { %v962_v21 = vpop.f32.mrb[13].mxu1  ;;  %v982_v27 = vsel %vm648_vm3, %v1640_v19, -inf }
 0x543   : > { %v1641_v22 = vpop.f32.mrb[14].mxu1  ;;  %v976_v23 = vsel %vm641_vm2, %v962_v21, -inf }
 0x544   : > { %977 = vmax.xlane.f32.xlu0 %v976_v23  ;;  %v965_v25 = vpop.f32.mrb[15].mxu1 }
 0x545   : > { %v979_v26 = vsel %vm641_vm2, %v965_v25, -inf }
 0x546   : > { %980 = vmax.xlane.f32.xlu1 %v979_v26 }
 0x548   : > { %983 = vmax.xlane.f32.xlu0 %v982_v27 }
 0x5d1   : > { %v978_v28 = vpop.xlane.xlu0 %977 }
 0x5d2   : > { %v985_v29 = vsub.f32 %v962_v21, %v978_v28 }
 0x5d3   : > { %v981_v30 = vpop.xlane.xlu1 %980 }
 0x5d4   : > { %v988_v31 = vmul.f32 1.442695, %v985_v29  ;;  %v986_v32 = vsub.f32 %v965_v25, %v981_v30 }
 0x5d5   : > { %v984_v33 = vpop.xlane.xlu0 %983 }
 0x5d6   : > { %1780 = vpow2.f32 %v988_v31  ;;  %v990_v34 = vmul.f32 1.442695, %v986_v32  ;;  %v987_v35 = vsub.f32 %v1640_v19, %v984_v33 }
 0x5d8   : > { %1782 = vpow2.f32 %v990_v34  ;;  %v992_v36 = vmul.f32 1.442695, %v987_v35 }
 0x5da   : > { %1784 = vpow2.f32 %v992_v36 }
 0x5e0   : > { %v1781_v37 = vpop.eup %1780 }
 0x5e1   : > { %v994_v38 = vsel %vm641_vm2, %v1781_v37, 0.0 }
 0x5e2   : > { %v1783_v39 = vpop.eup %1782  ;;  %995 = vadd.xlane.f32.xlu0 %v994_v38 }
 0x5e3   : > { %v997_v42 = vsel %vm641_vm2, %v1783_v39, 0.0 }
 0x5e4   : > { %v1785_v40 = vpop.eup %1784 }
 0x5e5   : > { %v1000_v41 = vsel %vm648_vm3, %v1785_v40, 0.0 }
 0x5e6   : > { %1001 = vadd.xlane.f32.xlu1 %v1000_v41  ;;  %998 = vadd.xlane.f32.xlu0 %v997_v42 }
 0x5f7   : > { %1013 = vrot.lane.b32.xlu1 %v1982_v8, %s1829_s16 }
 0x5fb   : > { %1077 = vrot.lane.b32.xlu1 %v1989_v13, %s1830_s17  ;;  %v812_v13 = vsel %vm641_vm2, %v2059_v18, -inf }
 0x5fc   : > { %1011 = vrot.lane.b32.xlu0 %v1991_v15, %s1829_s16 }
 0x5ff   : > { %1079 = vrot.lane.b32.xlu1 %v2003_v20, %s1830_s17 }
 0x600   : > { %1073 = vrot.lane.b32.xlu0 %v1984_v9, %s1830_s17 }
 0x603   : > { %1075 = vrot.lane.b32.xlu1 %v2009_v24, %s1830_s17 }
 0x61f   : > { %810 = vmax.xlane.f32.xlu0 %v809_v43 }
 0x623   : > { %816 = vmax.xlane.f32.xlu0 %v815_v44 }
 0x627   : > { %813 = vmax.xlane.f32.xlu1 %v812_v13 }
 0x66f   : > { %v996_v45 = vpop.xlane.xlu0 %995 }
 0x670   : > { %1786 = vrcp.f32 %v996_v45 }
 0x673   : > { %v999_v20 = vpop.xlane.xlu0 %998  ;;  %v1002_v46 = vpop.xlane.xlu1 %1001 }
 0x674   : > { %1788 = vrcp.f32 %v999_v20 }
 0x675   : > { %1790 = vrcp.f32 %v1002_v46 }
 0x677   : > { %v1012_v9 = vpop.permute.xlu0 %1011  ;;  %v1014_v24 = vpop.permute.xlu1 %1013 }
 0x678   : > { %v1023_v47 = vand.u32 %v1014_v24, %v1987_v12  ;;  %1642 = vmatprep.subr.bf16.mxu1 %v1012_v9 }
 0x679   : > { %1643 = vmatpush3.bf16.msra.mxu1 %v1012_v9 }
 0x67a   : > { %1644 = vmatprep.subr.bf16.mxu1 %v1023_v47  ;;  %v1787_v48 = vpop.eup %1786 }
 0x67b   : > { %v1078_v49 = vpop.permute.xlu1 %1077  ;;  %v1006_v52 = vmul.f32 %v1787_v48, %v1781_v37  ;;  %v1074_v57 = vpop.permute.xlu0 %1073 }
 0x67c   : > { %v1088_v58 = vsel %vm580_vm1, %v1078_v49, 0 }
 0x67d   : > { %1645 = vmatpush3.bf16.msra.mxu1 %v1023_v47 }
 0x67e   : > { %v1789_v50 = vpop.eup %1788  ;;  %1692 = vmatprep.subr.msk.bf16.mxu1 %vm580_vm1, %v1078_v49 }
 0x67f   : > { %v1791_v51 = vpop.eup %1790  ;;  %v1007_v53 = vmul.f32 %v1789_v50, %v1783_v39  ;;  %v1080_v59 = vpop.permute.xlu1 %1079 }
 0x680   : > { %v1008_v54 = vmul.f32 %v1791_v51, %v1785_v40  ;;  %v1091_v60 = vsel %vm580_vm1, %v1080_v59, 0 }
 0x681   : > { %v1009_v55 = vpack.c.bf16 %v1007_v53, %v1006_v52 }
 0x682   : > { %v1010_v56 = vpack.c.bf16 %v1008_v54, %v1008_v54 }
 0x683   : > { %1646 = vmatprep.mubr.msk.bf16.mxu1 %vm641_vm2, %v1009_v55  ;;  %v1076_v61 = vpop.permute.xlu1 %1075 }
 0x684   : > { %1647 = vmatmul.mubr.msk.bf16.vlgmr.msra.gmra.mrb[16].mxu1 %vm641_vm2, %v1010_v56 }
 0x685   : > { %1654 = vmatprep.mubr.msk.bf16.mxu1 %vm580_vm1, %v1074_v57 }
 0x686   : > { %1651 = vmatpush3.bf16.xpose.msra.mxu1 %v1088_v58 }
 0x687   : > { %1693 = vmatprep.subr.msk.bf16.mxu1 %vm580_vm1, %v1080_v59 }
 0x68e   : > { %1653 = vmatpush3.bf16.xpose.msra.mxu1 %v1091_v60 }
 0x695   : > { %1655 = vmatmul.mubr.msk.bf16.vlgmr.msra.gmra.mrb[20].mxu1 %vm580_vm1, %v1076_v61 }
 0x6ac   : > { %v811_v0 = vpop.xlane.xlu0 %810 }
 0x6ad   : > { %v818_v17 = vsub.f32 %v2057_v16, %v811_v0 }
 0x6af   : > { %v821_v21 = vmul.f32 1.442695, %v818_v17 }
 0x6b0   : > { %v817_v19 = vpop.xlane.xlu0 %816 }
 0x6b1   : > { %v820_v22 = vsub.f32 %v2055_v14, %v817_v19 }
 0x6b3   : > { %v825_v23 = vmul.f32 1.442695, %v820_v22 }
 0x6b4   : > { %v814_v62 = vpop.xlane.xlu1 %813 }
 0x6b5   : > { %v819_v1 = vsub.f32 %v2059_v18, %v814_v62 }
 0x6b7   : > { %v823_v10 = vmul.f32 1.442695, %v819_v1 }
 0x6b9   : > { %1792 = vpow2.f32 %v823_v10 }
 0x6ba   : > { %1794 = vpow2.f32 %v821_v21 }
 0x6bb   : > { %1796 = vpow2.f32 %v825_v23 }
 0x6c3   : > { %v1793_v27 = vpop.eup %1792 }
 0x6c4   : > { %v830_v16 = vsel %vm641_vm2, %v1793_v27, 0.0  ;;  %v1795_v14 = vpop.eup %1794 }
 0x6c5   : > { %v827_v32 = vsel %vm641_vm2, %v1795_v14, 0.0  ;;  %v1797_v33 = vpop.eup %1796 }
 0x6c6   : > { %v833_v34 = vsel %vm648_vm3, %v1797_v33, 0.0 }
 0x757   : > { %v2094_v63 = vpop.f32.mrb[16].mxu1 }
 0x758   : > { %v2097_v2 = vpop.f32.mrb[17].mxu1 }
 0x759   : > { %v1649_v3 = vpop.f32.mrb[18].mxu1 }
 0x75a   : > { %v2099_v4 = vpop.f32.mrb[19].mxu1 }
 0x75b   : > { %v1712_v5 = vpack.i.bf16 %v2099_v4, %v2097_v2 }
 0x768   : > { %v1656_v25 = vpop.f32.mrb[20].mxu1 }
 0x769   : > { %v1127_v18 = vpop.f32.mrb[21].mxu1  ;;  %v1147_v26 = vsel %vm648_vm3, %v1656_v25, -inf }
 0x76a   : > { %1148 = vmax.xlane.f32.xlu1 %v1147_v26  ;;  %v1657_v28 = vpop.f32.mrb[22].mxu1  ;;  %v1141_v29 = vsel %vm641_vm2, %v1127_v18, -inf  ;;  %v1757_v26 = vld [vmem:[%s2189_s4 + $0x18] sm:$0xff]  }
 0x76b   : > { %1142 = vmax.xlane.f32.xlu0 %v1141_v29  ;;  %v1130_v30 = vpop.f32.mrb[23].mxu1  ;;  %v1759_v28 = vld [vmem:[%s2189_s4 + $0x28] sm:$0xff]   ;;  %v1760_v29 = vld [vmem:[%s2189_s4 + $0x30] sm:$0xff]  }
 0x76c   : > { %v1144_v31 = vsel %vm641_vm2, %v1130_v30, -inf }
 0x76e   : > { %831 = vadd.xlane.f32.xlu1 %v830_v16 }
 0x76f   : > { %1145 = vmax.xlane.f32.xlu0 %v1144_v31  ;;  %v1761_v31 = vld [vmem:[%s2189_s4 + $0x38] sm:$0xff]  }
 0x773   : > { %828 = vadd.xlane.f32.xlu0 %v827_v32 }
 0x777   : > { %834 = vadd.xlane.f32.xlu0 %v833_v34 }
 0x7f7   : > { %v1149_v35 = vpop.xlane.xlu1 %1148 }
 0x7f8   : > { %v1152_v36 = vsub.f32 %v1656_v25, %v1149_v35  ;;  %v1143_v37 = vpop.xlane.xlu0 %1142  ;;  %v1754_v25 = vld [vmem:[%s2189_s4] sm:$0xff]  }
 0x7f9   : > { %v1150_v38 = vsub.f32 %v1127_v18, %v1143_v37  ;;  %v1756_v18 = vld [vmem:[%s2189_s4 + $0x10] sm:$0xff]  }
 0x7fa   : > { %v1157_v39 = vmul.f32 1.442695, %v1152_v36 }
 0x7fb   : > { %v1153_v40 = vmul.f32 1.442695, %v1150_v38  ;;  %v832_v42 = vpop.xlane.xlu1 %831 }
 0x7fc   : > { %1798 = vpow2.f32 %v1157_v39  ;;  %v1146_v41 = vpop.xlane.xlu0 %1145 }
 0x7fd   : > { %v1151_v43 = vsub.f32 %v1130_v30, %v1146_v41  ;;  %1800 = vpow2.f32 %v1153_v40 }
 0x7fe   : > { %1802 = vrcp.f32 %v832_v42 }
 0x7ff   : > { %v1155_v44 = vmul.f32 1.442695, %v1151_v43 }
 0x800   : > { %v829_v13 = vpop.xlane.xlu0 %828 }
 0x801   : > { %1804 = vpow2.f32 %v1155_v44 }
 0x802   : > { %1806 = vrcp.f32 %v829_v13 }
 0x804   : > { %v835_v53 = vpop.xlane.xlu0 %834 }
 0x805   : > { %1808 = vrcp.f32 %v835_v53  ;;  %v1816_v53 = vld [vmem:[%s1882_s26 + $0x10] sm:$0x1] }
 0x806   : > { %v1799_v45 = vpop.eup %1798 }
 0x807   : > { %v1165_v20 = vsel %vm648_vm3, %v1799_v45, 0.0  ;;  %v1801_v46 = vpop.eup %1800 }
 0x808   : > { %1166 = vadd.xlane.f32.xlu1 %v1165_v20  ;;  %v1803_v9 = vpop.eup %1802  ;;  %v1159_v47 = vsel %vm641_vm2, %v1801_v46, 0.0 }
 0x809   : > { %v840_v51 = vmul.f32 %v1803_v9, %v1793_v27  ;;  %v1758_v27 = vld [vmem:[%s2189_s4 + $0x20] sm:$0xff]  }
 0x80b   : > { %v1805_v24 = vpop.eup %1804 }
 0x80c   : > { %v1807_v48 = vpop.eup %1806  ;;  %1160 = vadd.xlane.f32.xlu1 %v1159_v47  ;;  %v1162_v49 = vsel %vm641_vm2, %v1805_v24, 0.0 }
 0x80d   : > { %1163 = vadd.xlane.f32.xlu0 %v1162_v49  ;;  %v839_v50 = vmul.f32 %v1807_v48, %v1795_v14 }
 0x80f   : > { %v842_v52 = vpack.c.bf16 %v840_v51, %v839_v50  ;;  %v1809_v58 = vpop.eup %1808 }
 0x810   : > { %v841_v61 = vmul.f32 %v1809_v58, %v1797_v33 }
 0x811   : > { %1630 = vmatprep.mubr.msk.bf16.mxu0 %vm641_vm2, %v842_v52 }
 0x812   : > { %v843_v1 = vpack.c.bf16 %v841_v61, %v841_v61 }
 0x81d   : > { %848 = vrot.lane.b32.xlu1 %v1982_v8, %s1828_s15 }
 0x821   : > { %1176 = vrot.lane.b32.xlu1 %v1991_v15, %s1830_s17 }
 0x823   : > { %846 = vrot.lane.b32.xlu0 %v1991_v15, %s1828_s15 }
 0x825   : > { %1178 = vrot.lane.b32.xlu1 %v1982_v8, %s1830_s17 }
 0x895   : > { %v1167_v54 = vpop.xlane.xlu1 %1166 }
 0x899   : > { %v1161_v55 = vpop.xlane.xlu1 %1160 }
 0x89a   : > { %1810 = vrcp.f32 %v1161_v55  ;;  %v1164_v56 = vpop.xlane.xlu0 %1163 }
 0x89b   : > { %1812 = vrcp.f32 %v1164_v56  ;;  %v1817_v56 = vld [vmem:[%s1882_s26] sm:$0xff] }
 0x89c   : > { %1814 = vrcp.f32 %v1167_v54 }
 0x89d   : > { %v849_v57 = vpop.permute.xlu1 %848 }
 0x89e   : > { %v858_v59 = vand.u32 %v849_v57, %v1987_v12  ;;  %v847_v60 = vpop.permute.xlu0 %846 }
 0x89f   : > { %1626 = vmatprep.subr.bf16.mxu0 %v847_v60 }
 0x8a0   : > { %1627 = vmatpush3.bf16.msra.mxu0 %v847_v60 }
 0x8a1   : > { %1628 = vmatprep.subr.bf16.mxu0 %v858_v59  ;;  %v1177_v15 = vpop.permute.xlu1 %1176 }
 0x8a4   : > { %v1811_v62 = vpop.eup %1810  ;;  %1629 = vmatpush3.bf16.msra.mxu0 %v858_v59 }
 0x8a5   : > { %v1813_v8 = vpop.eup %1812  ;;  %1658 = vmatprep.subr.bf16.mxu0 %v1177_v15  ;;  %v1179_v0 = vpop.permute.xlu1 %1178  ;;  %v1171_v3 = vmul.f32 %v1811_v62, %v1801_v46 }
 0x8a6   : > { %v1815_v10 = vpop.eup %1814  ;;  %v1188_v17 = vand.u32 %v1179_v0, %v1987_v12  ;;  %v1172_v19 = vmul.f32 %v1813_v8, %v1805_v24  ;;  %v1755_v12 = vld [vmem:[%s2189_s4 + $0x8] sm:$0xff]  }
 0x8a7   : > { %1631 = vmatmul.mubr.msk.bf16.vlgmr.msra.gmra.mrb[12].mxu0 %vm641_vm2, %v843_v1  ;;  %v1173_v22 = vmul.f32 %v1815_v10, %v1799_v45 }
 0x8a8   : > { %1659 = vmatpush3.bf16.msra.mxu0 %v1177_v15  ;;  %v1174_v21 = vpack.c.bf16 %v1172_v19, %v1171_v3  ;;  %v1818_v15 = vld [vmem:[%s1882_s26 + $0x8] sm:$0xff] }
 0x8a9   : > { %1660 = vmatprep.subr.bf16.mxu0 %v1188_v17  ;;  %v1175_v23 = vpack.c.bf16 %v1173_v22, %v1173_v22 }
 0x8aa   : > { %1662 = vmatprep.mubr.msk.bf16.mxu0 %vm641_vm2, %v1174_v21 }
 0x8ac   : > { %1661 = vmatpush3.bf16.msra.mxu0 %v1188_v17 }
 0x8ad   : > { %1666 = vmatprep.subr.bf16.mxu0 %v1754_v25 }
 0x8af   : > { %1663 = vmatmul.mubr.msk.bf16.vlgmr.msra.gmra.mrb[16].mxu0 %vm641_vm2, %v1175_v23 }
 0x8b0   : > { %1667 = vmatpush3.bf16.msra.mxu0 %v1754_v25 }
 0x8b1   : > { %1668 = vmatprep.subr.bf16.mxu0 %v1755_v12 }
 0x8b4   : > { %1669 = vmatpush3.bf16.msra.mxu0 %v1755_v12 }
 0x8b5   : > { %1670 = vmatprep.subr.bf16.mxu0 %v1756_v18 }
 0x8b8   : > { %1671 = vmatpush3.bf16.msra.mxu0 %v1756_v18 }
 0x8b9   : > { %1672 = vmatprep.subr.bf16.mxu0 %v1757_v26 }
 0x8bc   : > { %1673 = vmatpush3.bf16.msra.mxu0 %v1757_v26 }
 0x8bd   : > { %1674 = vmatprep.subr.bf16.mxu0 %v1758_v27 }
 0x8c0   : > { %1675 = vmatpush3.bf16.msra.mxu0 %v1758_v27 }
 0x8c1   : > { %1676 = vmatprep.subr.bf16.mxu0 %v1759_v28 }
 0x8c4   : > { %1677 = vmatpush3.bf16.msra.mxu0 %v1759_v28 }
 0x8c5   : > { %1678 = vmatprep.subr.bf16.mxu0 %v1760_v29 }
 0x8c8   : > { %1679 = vmatpush3.bf16.msra.mxu0 %v1760_v29 }
 0x8c9   : > { %1680 = vmatprep.subr.bf16.mxu0 %v1761_v31 }
 0x8cc   : > { %1681 = vmatpush3.bf16.msra.mxu0 %v1761_v31 }
 0x97a   : > { %v1632_v30 = vpop.f32.mrb[12].mxu0 }
 0x97b   : > { %1245 = vrot.lane.b32.xlu1 %v1632_v30, %s1830_s17  ;;  %v894_v16 = vpop.f32.mrb[13].mxu0 }
 0x97c   : > { %v1633_v14 = vpop.f32.mrb[14].mxu0 }
 0x97d   : > { %v897_v32 = vpop.f32.mrb[15].mxu0 }
 0x97e   : > { %v1707_v33 = vpack.i.bf16 %v897_v32, %v894_v16 }
 0x97f   : > { %1257 = vrot.lane.b32.xlu1 %v2094_v63, %s1829_s16 }
 0x980   : > { %1708 = vrot.lane.b32.xlu0 %v1707_v33, %s1830_s17 }
 0x982   : > { %v1664_v34 = vpop.f32.mrb[16].mxu0 }
 0x983   : > { %1269 = vrot.lane.b32.xlu1 %v1664_v34, %s1828_s15  ;;  %v1224_v35 = vpop.f32.mrb[17].mxu0 }
 0x984   : > { %1713 = vrot.lane.b32.xlu0 %v1712_v5, %s1829_s16  ;;  %v1665_v36 = vpop.f32.mrb[18].mxu0 }
 0x985   : > { %v1227_v37 = vpop.f32.mrb[19].mxu0 }
 0x986   : > { %v1717_v38 = vpack.i.bf16 %v1227_v37, %v1224_v35 }
 0x988   : > { %1718 = vrot.lane.b32.xlu0 %v1717_v38, %s1828_s15 }
 0x9ed   : > { %v1246_v39 = vpop.permute.xlu1 %1245 }
 0x9ee   : > { %v1276_v45 = vsel %vm580_vm1, %v2049_v6, %v1246_v39 }
 0x9f1   : > { %v1258_v63 = vpop.permute.xlu1 %1257 }
 0x9f2   : > { %v1709_v40 = vpop.permute.xlu0 %1708  ;;  %v1280_v4 = vsel %vm1277_vm4, %v1276_v45, %v1258_v63 }
 0x9f3   : > { %v1711_v42 = vunpack.i.h.bf16 %v1709_v40  ;;  %v1710_v43 = vunpack.i.l.bf16 %v1709_v40 }
 0x9f5   : > { %v1270_v2 = vpop.permute.xlu1 %1269  ;;  %v1275_v20 = vsel %vm580_vm1, %v2053_v11, %v1711_v42  ;;  %v1274_v46 = vsel %vm580_vm1, %v2051_v7, %v1710_v43  ;;  %v1527_v7 = vld [vmem:[%s2190_s5] ss:$0 sm:$0xff] }
 0x9f6   : > { %v1714_v41 = vpop.permute.xlu0 %1713  ;;  %v1284_v47 = vsel %vm1281_vm5, %v1280_v4, %v1270_v2 }
 0x9f7   : > { %v1716_v44 = vunpack.i.h.bf16 %v1714_v41  ;;  %v1715_v13 = vunpack.i.l.bf16 %v1714_v41  ;;  %v1286_v52 = vpack.c.bf16 %v1284_v47, %v1284_v47 }
 0x9f9   : > { %v1278_v48 = vsel %vm1277_vm4, %v1274_v46, %v1715_v13  ;;  %v1279_v6 = vsel %vm1277_vm4, %v1275_v20, %v1716_v44 }
 0x9fa   : > { %v1719_v5 = vpop.permute.xlu0 %1718 }
 0x9fb   : > { %v1721_v9 = vunpack.i.h.bf16 %v1719_v5  ;;  %v1720_v24 = vunpack.i.l.bf16 %v1719_v5 }
 0x9fd   : > { %v1282_v49 = vsel %vm1281_vm5, %v1278_v48, %v1720_v24  ;;  %v1283_v50 = vsel %vm1281_vm5, %v1279_v6, %v1721_v9 }
 0x9fe   : > { %v1285_v51 = vpack.c.bf16 %v1283_v50, %v1282_v49 }
 0xa00   : > { %1682 = vmatprep.mubr.bf16.mxu0 %v1285_v51 }
 0xa01   : > { %1683 = vmatmul.mubr.bf16.vlgmr.msra.gmra.mrb[20].mxu0 %v1286_v52 }
 0xad4   : > { %v1684_v11 = vpop.f32.mrb[20].mxu0 }
 0xad5   : > { %v1401_v54 = vadd.f32 %v1816_v53, %v1684_v11  ;;  %v1385_v55 = vpop.f32.mrb[21].mxu0 }
 0xad6   : > { %v1399_v57 = vadd.f32 %v1817_v56, %v1385_v55  ;;  %v1685_v58 = vpop.f32.mrb[22].mxu0 }
 0xad7   : > { %v1411_v59 = vadd.f32 %v1527_v7, %v1401_v54  ;;  %v1388_v60 = vpop.f32.mrb[23].mxu0 }
 0xad8   : > { %v1409_v61 = vadd.f32 %v1527_v7, %v1399_v57  ;;  %v1400_v62 = vadd.f32 %v1818_v15, %v1388_v60 }
 0xad9   : > { %1414 = vst [vmem:[%s251_s18 + $0x10] sm:$0x1] %v1411_v59 }
 0xada   : > { %1412 = vst [vmem:[%s251_s18] sm:$0xff] %v1409_v61  ;;  %v1410_v8 = vadd.f32 %v1527_v7, %v1400_v62 }
 0xadc   : > { %1413 = vst [vmem:[%s251_s18 + $0x8] sm:$0xff] %v1410_v8 }
 0xadd PF: > { %s16_s21 = sadd.s32 1, %s1825_s21  }
 0xade   : > { %p13_p4 = scmp.ge.s32.totalorder %s16_s21, 4  }
 0xae0   :  { %15 = sbr.rel (!%p13_p4) target bundleno = 1 (0x1), region = 74 }

// kernel: vit_forward.11
= control target key start
LH: loop header
LB: loop body
LE: loop exit
PB: predicated region body
PF: predicated region fallthrough
CT: control target
= control target key end

     0   :  { %vm25_vm0 = vcmask 1041408   ;;  %s341_s0 = inlined_call_operand.vmem [shape: f32[2,128], index: 0, kind: input, shape index: {}]   ;;  %s342_s1 = inlined_call_operand.vmem [shape: f32[1,128], index: 1, kind: input, shape index: {}]   ;;  %s343_s2 = inlined_call_operand.vmem [shape: f32[1,128], index: 2, kind: input, shape index: {}]   ;;  %s344_s3 = inlined_call_operand.vmem [shape: bf16[128,128], index: 3, kind: input, shape index: {}]   ;;  %s345_s4 = inlined_call_operand.vmem [shape: f32[1,128], index: 4, kind: input, shape index: {}]   ;;  %s346_s5 = inlined_call_operand.hbm [shape: f32[2,128], index: 5, kind: output, shape index: {}]  }
   0x1   :  { %v22_v0 = vld [vmem:[%s341_s0] sm:$0x3] }
   0x2   :  { %v26_v1 = vsel %vm25_vm0, %v22_v0, 0.0 }
   0x3   :  { %27 = vadd.xlane.f32.xlu0 %v26_v1 }
   0x4   :  { %10 = vsyncpa [#allocation3], 0  ;;  %v224_v2 = vld [vmem:[%s344_s3] sm:$0xff]   ;;  %v258_v3 = vmov 0.0   ;;  %v225_v4 = vld [vmem:[%s344_s3 + $0x8] sm:$0xff]   ;;  %vm259_vm1 = vmmov 0  }
   0x5   :  { %201 = vmatprep.subr.bf16.mxu0 %v258_v3  ;;  %v226_v10 = vld [vmem:[%s344_s3 + $0x10] sm:$0xff]   ;;  %v227_v11 = vld [vmem:[%s344_s3 + $0x18] sm:$0xff]   ;;  %v228_v12 = vld [vmem:[%s344_s3 + $0x20] sm:$0xff]   ;;  %217 = vmatprep.mubr.msk.bf16.mxu0 %vm259_vm1, %v258_v3  ;;  %s260_s15 = smov [#allocation2]  }
   0x6   :  { %202 = vmatpush3.bf16.msra.mxu0 %v224_v2  ;;  %v229_v13 = vld [vmem:[%s344_s3 + $0x28] sm:$0xff]   ;;  %v230_v14 = vld [vmem:[%s344_s3 + $0x30] sm:$0xff]   ;;  %v231_v15 = vld [vmem:[%s344_s3 + $0x38] sm:$0xff]   ;;  %s173_s16 = sshll.u32 %s260_s15, 4  ;;  %s174_s16 = int_to_ptr.vmem [resolvable:$true] %s173_s16 }
   0x7   :  { %203 = vmatprep.subr.bf16.mxu0 %v258_v3  ;;  %v181_v20 = vld [vmem:[%s342_s1] ss:$0 sm:$0xff]  ;;  %s234_s1 = scalar_lea.vmem %s174_s16, 32  ;;  %p239_p1 = scmp.lt.s32.totalorder %s174_s16, %s174_s16 }
   0x8   :  { %v182_v22 = vld [vmem:[%s343_s2] ss:$0 sm:$0xff]  ;;  %p235_p0 = scmp.ne.s32.totalorder %s174_s16, %s234_s1  ;;  %p240_p2 = scmp.lt.s32.totalorder %s234_s1, %s234_s1 }
   0x9   :  { %v183_v26 = vld [vmem:[%s345_s4] ss:$0 sm:$0xff] }
   0xa   :  { %204 = vmatpush3.bf16.msra.mxu0 %v225_v4  ;;  %p241_p3 = por %p240_p2, %p239_p1 }
   0xb   :  { %205 = vmatprep.subr.bf16.mxu0 %v258_v3 }
   0xc   :  { %p242_p4 = pnand %p241_p3, %p235_p0 }
   0xe   :  { %206 = vmatpush3.bf16.msra.mxu0 %v226_v10 }
   0xf   :  { %207 = vmatprep.subr.bf16.mxu0 %v258_v3 }
  0x12   :  { %208 = vmatpush3.bf16.msra.mxu0 %v227_v11 }
  0x13   :  { %209 = vmatprep.subr.bf16.mxu0 %v258_v3 }
  0x16   :  { %210 = vmatpush3.bf16.msra.mxu0 %v228_v12 }
  0x17   :  { %211 = vmatprep.subr.bf16.mxu0 %v258_v3 }
  0x1a   :  { %212 = vmatpush3.bf16.msra.mxu0 %v229_v13 }
  0x1b   :  { %213 = vmatprep.subr.bf16.mxu0 %v258_v3 }
  0x1e   :  { %214 = vmatpush3.bf16.msra.mxu0 %v230_v14 }
  0x1f   :  { %215 = vmatprep.subr.bf16.mxu0 %v258_v3 }
  0x22   :  { %216 = vmatpush3.bf16.msra.mxu0 %v231_v15 }
  0x90   :  { %v28_v5 = vpop.xlane.xlu0 %27 }
  0x91   :  { %v30_v6 = vmul.f32 0.0078125, %v28_v5 }
  0x93   :  { %v31_v7 = vsub.f32 %v22_v0, %v30_v6 }
  0x95   :  { %v32_v8 = vmul.f32 %v31_v7, %v31_v7 }
  0x97   :  { %v33_v9 = vsel %vm25_vm0, %v32_v8, 0.0 }
  0x98   :  { %34 = vadd.xlane.f32.xlu0 %v33_v9 }
 0x125   :  { %v35_v16 = vpop.xlane.xlu0 %34 }
 0x126   :  { %v36_v17 = vmul.f32 0.0078125, %v35_v16 }
 0x128   :  { %v37_v18 = vadd.f32 1e-05, %v36_v17 }
 0x12a   :  { %232 = vrsqrt.f32 %v37_v18 }
 0x134   :  { %v233_v19 = vpop.eup %232 }
 0x135   :  { %v39_v21 = vmul.f32 %v233_v19, %v31_v7 }
 0x137   :  { %v46_v23 = vmul.f32 %v181_v20, %v39_v21 }
 0x139   :  { %v53_v24 = vadd.f32 %v182_v22, %v46_v23 }
 0x13b   :  { %v70_v25 = vpack.c.bf16 %v53_v24, %v53_v24 }
 0x13d   :  { %218 = vmatmul.mubr.bf16.vlgmr.msra.gmra.mrb[0].mxu0 %v70_v25 }
 0x210   :  { %v160_v27 = vpop.f32.mrb[0].mxu0 }
 0x211   :  { %v161_v28 = vadd.f32 %v183_v26, %v160_v27  ;;  %v219_v29 = vpop.f32.mrb[1].mxu0 }
 0x212   :  { %v163_v30 = vpop.f32.mrb[2].mxu0 }
 0x213   :  { %166 = vst [vmem:[#allocation2] sm:$0x3] %v161_v28  ;;  %v220_v31 = vpop.f32.mrb[3].mxu0 }
 0x214   :  { %245 = shalt.err (!%p242_p4)
}
 0x215   :  { %s246_s4 = scalar_lea.hbm %s346_s5, 32 }
 0x216   :  { %p247_p5 = scmp.ne.s32.totalorder %s346_s5, %s246_s4  ;;  %p250_p6 = scmp.lt.u32.totalorder %s246_s4, %s346_s5 }
 0x218   :  { %p252_p7 = pnand %p250_p6, %p247_p5 }
 0x21a   :  { %255 = shalt.err (!%p252_p7)
}
 0x21b   :  { %176 = dma.vmem_to_hbm [thread:$0]  %s174_s16, 32, %s346_s5, [#allocation3]  }
 0x21c   :  { %256 = dma.done.wait [#allocation3], 32  }
 0x21d   :  { %257 = vsyncadd [#allocation3], 4294967264 }
 0x21e   :  { %180 = vsyncpa [#allocation3], 1 }

// kernel: vit_forward.8
= control target key start
LH: loop header
LB: loop body
LE: loop exit
PB: predicated region body
PF: predicated region fallthrough
CT: control target
= control target key end

     0   :  { %vm42_vm0 = vcmask 1041408   ;;  %v934_v40 = vmov 0   ;;  %s1366_s0 = inlined_call_operand.vmem [shape: f32[34,128], index: 0, kind: input, shape index: {}]   ;;  %s1367_s3 = inlined_call_operand.vmem [shape: bf16[128,256], index: 3, kind: input, shape index: {}]   ;;  %s1368_s1 = inlined_call_operand.vmem [shape: f32[1,128], index: 1, kind: input, shape index: {}]   ;;  %s1369_s2 = inlined_call_operand.vmem [shape: f32[1,128], index: 2, kind: input, shape index: {}]   ;;  %s1370_s5 = inlined_call_operand.vmem [shape: bf16[256,128], index: 5, kind: input, shape index: {}]   ;;  %s1371_s4 = inlined_call_operand.vmem [shape: f32[1,256], index: 4, kind: input, shape index: {}]   ;;  %s1372_s6 = inlined_call_operand.vmem [shape: f32[1,128], index: 6, kind: input, shape index: {}]   ;;  %s1373_s7 = inlined_call_operand.vmem [shape: f32[34,128], index: 7, kind: output, shape index: {}]  }
   0x1   :  { %v27_v0 = vld [vmem:[%s1366_s0] sm:$0xff]  ;;  %v29_v1 = vld [vmem:[%s1366_s0 + $0x10] sm:$0xff]  ;;  %v28_v2 = vld [vmem:[%s1366_s0 + $0x8] sm:$0xff]  ;;  %258 = vmatprep.mubr.bf16.mxu0 %v934_v40 }
   0x2   :  { %34 = vadd.xlane.f32.xlu0 %v27_v0  ;;  %38 = vadd.xlane.f32.xlu1 %v29_v1  ;;  %v30_v3 = vld [vmem:[%s1366_s0 + $0x18] sm:$0xff]  ;;  %v31_v4 = vld [vmem:[%s1366_s0 + $0x20] sm:$0x3]  ;;  %v839_v6 = vld [vmem:[%s1367_s3 + $0x4] ss:$8 sps:$4 sm:$0xff]  }
   0x3   :  { %v43_v5 = vsel %vm42_vm0, %v31_v4, 0.0  ;;  %v841_v7 = vld [vmem:[%s1367_s3] ss:$8 sps:$4 sm:$0xff]   ;;  %226 = vmatprep.subr.bf16.mxu0 %v839_v6  ;;  %v842_v8 = vld [vmem:[%s1367_s3 + $0x14] ss:$8 sps:$4 sm:$0xff]  }
   0x4   :  { %227 = vmatpush1.bf16.msra.mxu0 %v841_v7  ;;  %v844_v30 = vld [vmem:[%s1367_s3 + $0x10] ss:$8 sps:$4 sm:$0xff]   ;;  %v845_v31 = vld [vmem:[%s1367_s3 + $0x24] ss:$8 sps:$4 sm:$0xff]   ;;  %v847_v32 = vld [vmem:[%s1367_s3 + $0x20] ss:$8 sps:$4 sm:$0xff]  }
   0x5   :  { %228 = vmatprep.subr.bf16.mxu0 %v842_v8  ;;  %v848_v33 = vld [vmem:[%s1367_s3 + $0x34] ss:$8 sps:$4 sm:$0xff]   ;;  %v850_v34 = vld [vmem:[%s1367_s3 + $0x30] ss:$8 sps:$4 sm:$0xff]   ;;  %v851_v35 = vld [vmem:[%s1367_s3 + $0x44] ss:$8 sps:$4 sm:$0xff]  }
   0x6   :  { %36 = vadd.xlane.f32.xlu0 %v28_v2  ;;  %40 = vadd.xlane.f32.xlu1 %v30_v3  ;;  %v853_v36 = vld [vmem:[%s1367_s3 + $0x40] ss:$8 sps:$4 sm:$0xff]   ;;  %v854_v37 = vld [vmem:[%s1367_s3 + $0x54] ss:$8 sps:$4 sm:$0xff]   ;;  %v856_v38 = vld [vmem:[%s1367_s3 + $0x50] ss:$8 sps:$4 sm:$0xff]  }
   0x7   :  { %v857_v39 = vld [vmem:[%s1367_s3 + $0x64] ss:$8 sps:$4 sm:$0xff]   ;;  %v859_v41 = vld [vmem:[%s1367_s3 + $0x60] ss:$8 sps:$4 sm:$0xff]   ;;  %v860_v42 = vld [vmem:[%s1367_s3 + $0x74] ss:$8 sps:$4 sm:$0xff]  }
   0x8   :  { %229 = vmatpush1.bf16.msra.mxu0 %v844_v30  ;;  %v862_v43 = vld [vmem:[%s1367_s3 + $0x70] ss:$8 sps:$4 sm:$0xff]   ;;  %v768_v61 = vld [vmem:[%s1368_s1] ss:$0 sm:$0xff]  ;;  %v873_v30 = vld [vmem:[%s1370_s5 + $0x68] sm:$0xff]  }
   0x9   :  { %230 = vmatprep.subr.bf16.mxu0 %v845_v31  ;;  %v874_v31 = vld [vmem:[%s1370_s5 + $0x28] sm:$0xff]  }
   0xa   :  { %44 = vadd.xlane.f32.xlu0 %v43_v5 }
   0xc   :  { %231 = vmatpush1.bf16.msra.mxu0 %v847_v32  ;;  %v875_v32 = vld [vmem:[%s1370_s5 + $0x70] sm:$0xff]  }
   0xd   :  { %232 = vmatprep.subr.bf16.mxu0 %v848_v33  ;;  %v876_v33 = vld [vmem:[%s1370_s5 + $0x30] sm:$0xff]  }
  0x10   :  { %233 = vmatpush1.bf16.msra.mxu0 %v850_v34  ;;  %v877_v34 = vld [vmem:[%s1370_s5 + $0x78] sm:$0xff]  }
  0x11   :  { %234 = vmatprep.subr.bf16.mxu0 %v851_v35  ;;  %v878_v35 = vld [vmem:[%s1370_s5 + $0x38] sm:$0xff]  }
  0x14   :  { %235 = vmatpush1.bf16.msra.mxu0 %v853_v36  ;;  %v136_v36 = vlaneseq }
  0x15   :  { %236 = vmatprep.subr.bf16.mxu0 %v854_v37 }
  0x16   :  { %v137_v37 = vshrl.u32 %v136_v36, 7 }
  0x18   :  { %237 = vmatpush1.bf16.msra.mxu0 %v856_v38  ;;  %v138_v38 = vsub.s32 0, %v137_v37 }
  0x19   :  { %238 = vmatprep.subr.bf16.mxu0 %v857_v39  ;;  %v134_v39 = vld [vmem:[%s1371_s4] sm:$0x3] }
  0x1c   :  { %239 = vmatpush1.bf16.msra.mxu0 %v859_v41  ;;  %v1123_v41 = vrot.slane %v134_v39, %v138_v38 }
  0x1d   :  { %240 = vmatprep.subr.bf16.mxu0 %v860_v42 }
  0x20   :  { %241 = vmatpush1.bf16.msra.mxu0 %v862_v43 }
  0x8f   :  { %v35_v9 = vpop.xlane.xlu0 %34  ;;  %v39_v10 = vpop.xlane.xlu1 %38 }
  0x90   :  { %v47_v11 = vmul.f32 0.0078125, %v35_v9  ;;  %v49_v12 = vmul.f32 0.0078125, %v39_v10 }
  0x92   :  { %v1001_v13 = vsub.f32 %v27_v0, %v47_v11  ;;  %v1003_v14 = vsub.f32 %v29_v1, %v49_v12 }
  0x93   :  { %v37_v15 = vpop.xlane.xlu0 %36  ;;  %v41_v16 = vpop.xlane.xlu1 %40 }
  0x94   :  { %v48_v17 = vmul.f32 0.0078125, %v37_v15  ;;  %v57_v18 = vmul.f32 %v1001_v13, %v1001_v13  ;;  %v50_v19 = vmul.f32 0.0078125, %v41_v16  ;;  %v59_v22 = vmul.f32 %v1003_v14, %v1003_v14 }
  0x96   :  { %v1007_v20 = vsub.f32 %v28_v2, %v48_v17  ;;  %62 = vadd.xlane.f32.xlu1 %v57_v18  ;;  %v1009_v21 = vsub.f32 %v30_v3, %v50_v19  ;;  %v769_v2 = vld [vmem:[%s1369_s2] ss:$0 sm:$0xff] }
  0x97   :  { %v45_v23 = vpop.xlane.xlu0 %44 }
  0x98   :  { %v51_v24 = vmul.f32 0.0078125, %v45_v23  ;;  %v58_v25 = vmul.f32 %v1007_v20, %v1007_v20  ;;  %v60_v27 = vmul.f32 %v1009_v21, %v1009_v21  ;;  %v866_v23 = vld [vmem:[%s1370_s5 + $0x8] sm:$0xff]  }
  0x9a   :  { %v1015_v26 = vsub.f32 %v31_v4, %v51_v24  ;;  %66 = vadd.xlane.f32.xlu1 %v59_v22  ;;  %64 = vadd.xlane.f32.xlu0 %v58_v25  ;;  %v865_v22 = vld [vmem:[%s1370_s5 + $0x48] sm:$0xff]   ;;  %v867_v24 = vld [vmem:[%s1370_s5 + $0x50] sm:$0xff]  }
  0x9b   :  { %v868_v25 = vld [vmem:[%s1370_s5 + $0x10] sm:$0xff]  }
  0x9c   :  { %v61_v28 = vmul.f32 %v1015_v26, %v1015_v26 }
  0x9e   :  { %68 = vadd.xlane.f32.xlu0 %v60_v27  ;;  %v70_v29 = vsel %vm42_vm0, %v61_v28, 0.0  ;;  %v870_v27 = vld [vmem:[%s1370_s5 + $0x18] sm:$0xff]   ;;  %v871_v28 = vld [vmem:[%s1370_s5 + $0x60] sm:$0xff]  }
  0x9f   :  { %71 = vadd.xlane.f32.xlu1 %v70_v29  ;;  %v872_v29 = vld [vmem:[%s1370_s5 + $0x20] sm:$0xff]  }
 0x123   :  { %v63_v44 = vpop.xlane.xlu1 %62 }
 0x124   :  { %v73_v45 = vmul.f32 0.0078125, %v63_v44 }
 0x126   :  { %v78_v46 = vadd.f32 1e-05, %v73_v45 }
 0x127   :  { %v67_v47 = vpop.xlane.xlu1 %66  ;;  %v65_v48 = vpop.xlane.xlu0 %64 }
 0x128   :  { %879 = vrsqrt.f32 %v78_v46  ;;  %v75_v49 = vmul.f32 0.0078125, %v67_v47  ;;  %v74_v50 = vmul.f32 0.0078125, %v65_v48 }
 0x12a   :  { %v79_v51 = vadd.f32 1e-05, %v74_v50  ;;  %v80_v52 = vadd.f32 1e-05, %v75_v49 }
 0x12b   :  { %v69_v53 = vpop.xlane.xlu0 %68 }
 0x12c   :  { %v76_v54 = vmul.f32 0.0078125, %v69_v53  ;;  %v72_v55 = vpop.xlane.xlu1 %71  ;;  %881 = vrsqrt.f32 %v79_v51 }
 0x12d   :  { %v77_v56 = vmul.f32 0.0078125, %v72_v55  ;;  %883 = vrsqrt.f32 %v80_v52 }
 0x12e   :  { %v81_v57 = vadd.f32 1e-05, %v76_v54 }
 0x12f   :  { %v82_v58 = vadd.f32 1e-05, %v77_v56 }
 0x130   :  { %885 = vrsqrt.f32 %v81_v57 }
 0x131   :  { %887 = vrsqrt.f32 %v82_v58 }
 0x132   :  { %v880_v59 = vpop.eup %879 }
 0x133   :  { %v88_v60 = vmul.f32 %v880_v59, %v1001_v13 }
 0x135   :  { %v99_v0 = vmul.f32 %v768_v61, %v88_v60 }
 0x136   :  { %v882_v62 = vpop.eup %881 }
 0x137   :  { %v89_v63 = vmul.f32 %v882_v62, %v1007_v20  ;;  %v884_v1 = vpop.eup %883  ;;  %v110_v6 = vadd.f32 %v769_v2, %v99_v0 }
 0x138   :  { %v90_v8 = vmul.f32 %v884_v1, %v1003_v14  ;;  %v863_v14 = vld [vmem:[%s1370_s5 + $0x40] sm:$0xff]  }
 0x139   :  { %v100_v4 = vmul.f32 %v768_v61, %v89_v63  ;;  %803 = vmatprep.subr.bf16.mxu1 %v863_v14 }
 0x13a   :  { %v886_v3 = vpop.eup %885  ;;  %v101_v12 = vmul.f32 %v768_v61, %v90_v8 }
 0x13b   :  { %v91_v5 = vmul.f32 %v886_v3, %v1009_v21  ;;  %v111_v7 = vadd.f32 %v769_v2, %v100_v4  ;;  %v888_v11 = vpop.eup %887  ;;  %v864_v21 = vld [vmem:[%s1370_s5] sm:$0xff]  }
 0x13c   :  { %v92_v15 = vmul.f32 %v888_v11, %v1015_v26  ;;  %v112_v16 = vadd.f32 %v769_v2, %v101_v12  ;;  %804 = vmatpush3.bf16.msra.mxu1 %v864_v21  ;;  %v869_v26 = vld [vmem:[%s1370_s5 + $0x58] sm:$0xff]  }
 0x13d   :  { %v115_v9 = vpack.c.bf16 %v111_v7, %v110_v6  ;;  %v102_v10 = vmul.f32 %v768_v61, %v91_v5  ;;  %805 = vmatprep.subr.bf16.mxu1 %v865_v22 }
 0x13e   :  { %v103_v18 = vmul.f32 %v768_v61, %v92_v15 }
 0x13f   :  { %259 = vmatmul.mubr.bf16.vlgmr.msra.gmra.mrb[0].mxu0 %v115_v9  ;;  %v113_v13 = vadd.f32 %v769_v2, %v102_v10 }
 0x140   :  { %268 = vmatprep.mubr.bf16.mxu0 %v934_v40  ;;  %v114_v19 = vadd.f32 %v769_v2, %v103_v18  ;;  %806 = vmatpush3.bf16.msra.mxu1 %v866_v23 }
 0x141   :  { %v116_v17 = vpack.c.bf16 %v113_v13, %v112_v16  ;;  %807 = vmatprep.subr.bf16.mxu1 %v867_v24 }
 0x142   :  { %v117_v20 = vpack.c.bf16 %v114_v19, %v114_v19 }
 0x144   :  { %808 = vmatpush3.bf16.msra.mxu1 %v868_v25 }
 0x145   :  { %809 = vmatprep.subr.bf16.mxu1 %v869_v26 }
 0x147   :  { %269 = vmatmul.mubr.bf16.gmra.mrb[4].mxu0 %v116_v17 }
 0x148   :  { %278 = vmatprep.mubr.bf16.mxu0 %v934_v40  ;;  %810 = vmatpush3.bf16.msra.mxu1 %v870_v27  ;;  %v142_v40 = vsub.s32 1, %v137_v37 }
 0x149   :  { %811 = vmatprep.subr.bf16.mxu1 %v871_v28 }
 0x14a   :  { %v1125_v42 = vrot.slane %v134_v39, %v142_v40 }
 0x14c   :  { %812 = vmatpush3.bf16.msra.mxu1 %v872_v29 }
 0x14d   :  { %813 = vmatprep.subr.bf16.mxu1 %v873_v30 }
 0x14f   :  { %279 = vmatmul.mubr.bf16.gmra.mrb[8].mxu0 %v117_v20  ;;  %v935_v20 = vmov -1.0  }
 0x150   :  { %814 = vmatpush3.bf16.msra.mxu1 %v874_v31 }
 0x151   :  { %815 = vmatprep.subr.bf16.mxu1 %v875_v32 }
 0x154   :  { %816 = vmatpush3.bf16.msra.mxu1 %v876_v33 }
 0x155   :  { %817 = vmatprep.subr.bf16.mxu1 %v877_v34 }
 0x158   :  { %818 = vmatpush3.bf16.msra.mxu1 %v878_v35 }
 0x212   :  { %v260_v43 = vpop.f32.mrb[0].mxu0 }
 0x213   :  { %v261_v44 = vadd.f32 %v260_v43, %v1123_v41  ;;  %v262_v45 = vpop.f32.mrb[1].mxu0 }
 0x214   :  { %v1129_v46 = vadd.f32 %v262_v45, %v1125_v42  ;;  %v264_v47 = vpop.f32.mrb[2].mxu0 }
 0x215   :  { %v297_v48 = vmul.f32 0.70710677, %v261_v44  ;;  %v265_v49 = vadd.f32 %v264_v47, %v1123_v41  ;;  %v266_v50 = vpop.f32.mrb[3].mxu0  ;;  %v1152_v11 = vmul.f32 0.5, %v261_v44 }
 0x216   :  { %v1133_v52 = vmul.f32 0.70710677, %v1129_v46  ;;  %v1136_v56 = vadd.f32 %v266_v50, %v1125_v42 }
 0x217   :  { %v327_v51 = vand.u32 2147483647, %v297_v48  ;;  %v299_v53 = vmul.f32 0.70710677, %v265_v49  ;;  %vm307_vm1 = vcmp.ge.f32.partialorder %v297_v48, 0.0  ;;  %v1165_v21 = vmul.f32 0.5, %v265_v49 }
 0x218   :  { %v328_v58 = vand.u32 2147483647, %v1133_v52  ;;  %v1140_v0 = vmul.f32 0.70710677, %v1136_v56  ;;  %v1163_v14 = vsel %vm307_vm1, 1.0, %v935_v20  ;;  %vm308_vm7 = vcmp.ge.f32.partialorder %v1133_v52, 0.0 }
 0x219   :  { %v337_v54 = vmul.f32 0.3275911, %v327_v51  ;;  %v329_v55 = vand.u32 2147483647, %v299_v53  ;;  %v467_v62 = vsub.f32 0.0, %v327_v51  ;;  %vm309_vm2 = vcmp.ge.f32.partialorder %v299_v53, 0.0 }
 0x21a   :  { %v270_v60 = vpop.f32.mrb[4].mxu0  ;;  %v338_v3 = vmul.f32 0.3275911, %v328_v58  ;;  %v468_v6 = vsub.f32 0.0, %v328_v58  ;;  %v330_v9 = vand.u32 2147483647, %v1140_v0 }
 0x21b   :  { %v347_v57 = vadd.f32 1.0, %v337_v54  ;;  %v339_v59 = vmul.f32 0.3275911, %v329_v55  ;;  %v272_v61 = vpop.f32.mrb[5].mxu0  ;;  %v271_v4 = vadd.f32 %v270_v60, %v1123_v41  ;;  %v477_v8 = vmul.f32 %v467_v62, %v327_v51 }
 0x21c   :  { %v274_v1 = vpop.f32.mrb[6].mxu0  ;;  %v1144_v5 = vadd.f32 %v272_v61, %v1125_v42  ;;  %v469_v12 = vsub.f32 0.0, %v329_v55  ;;  %v348_v16 = vadd.f32 1.0, %v338_v3  ;;  %v478_v25 = vmul.f32 %v468_v6, %v328_v58 }
 0x21d   :  { %889 = vrcp.f32 %v347_v57  ;;  %v349_v63 = vadd.f32 1.0, %v339_v59  ;;  %v276_v2 = vpop.f32.mrb[7].mxu0  ;;  %v1147_v7 = vadd.f32 %v274_v1, %v1123_v41  ;;  %v1150_v10 = vmul.f32 0.70710677, %v271_v4 }
 0x21e   :  { %v1155_v13 = vmul.f32 0.70710677, %v1144_v5  ;;  %v487_v24 = vmul.f32 1.442695, %v477_v8  ;;  %v470_v26 = vsub.f32 0.0, %v330_v9  ;;  %v479_v29 = vmul.f32 %v469_v12, %v329_v55 }
 0x21f   :  { %891 = vrcp.f32 %v349_v63  ;;  %v331_v17 = vand.u32 2147483647, %v1150_v10  ;;  %v1159_v18 = vmul.f32 0.70710677, %v1147_v7  ;;  %v340_v34 = vmul.f32 0.3275911, %v330_v9 }
 0x220   :  { %v332_v22 = vand.u32 2147483647, %v1155_v13  ;;  %893 = vrcp.f32 %v348_v16  ;;  %v1172_v36 = vadd.f32 %v276_v2, %v1125_v42  ;;  %v489_v43 = vmul.f32 1.442695, %v478_v25 }
 0x221   :  { %v341_v27 = vmul.f32 0.3275911, %v331_v17  ;;  %v471_v30 = vsub.f32 0.0, %v331_v17  ;;  %v333_v32 = vand.u32 2147483647, %v1159_v18  ;;  %v1180_v44 = vsel %vm309_vm2, 1.0, %v935_v20 }
 0x222   :  { %v280_v15 = vpop.f32.mrb[8].mxu0  ;;  %v342_v31 = vmul.f32 0.3275911, %v332_v22  ;;  %v480_v45 = vmul.f32 %v470_v26, %v330_v9  ;;  %v491_v51 = vmul.f32 1.442695, %v479_v29  ;;  %v472_v54 = vsub.f32 0.0, %v332_v22 }
 0x223   :  { %v282_v19 = vpop.f32.mrb[9].mxu0  ;;  %v351_v35 = vadd.f32 1.0, %v341_v27  ;;  %v343_v39 = vmul.f32 0.3275911, %v333_v32  ;;  %v1176_v40 = vadd.f32 %v280_v15, %v1123_v41  ;;  %v481_v48 = vmul.f32 %v471_v30, %v331_v17 }
 0x224   :  { %v284_v23 = vpop.f32.mrb[10].mxu0  ;;  %v352_v38 = vadd.f32 1.0, %v342_v31  ;;  %v1185_v55 = vmul.f32 0.70710677, %v1172_v36  ;;  %v350_v57 = vadd.f32 1.0, %v340_v34  ;;  %v1192_v60 = vmul.f32 0.5, %v271_v4 }
 0x225   :  { %v285_v28 = vpop.f32.mrb[11].mxu0  ;;  %895 = vrcp.f32 %v351_v35  ;;  %v353_v49 = vadd.f32 1.0, %v343_v39  ;;  %v1190_v58 = vmul.f32 0.70710677, %v1176_v40  ;;  %v493_v59 = vmul.f32 1.442695, %v480_v45 }
 0x226   :  { %897 = vrcp.f32 %v352_v38  ;;  %v334_v61 = vand.u32 2147483647, %v1185_v55  ;;  %v495_v1 = vmul.f32 1.442695, %v481_v48  ;;  %v482_v2 = vmul.f32 %v472_v54, %v332_v22 }
 0x227   :  { %v1169_v33 = vpop.eup %889  ;;  %899 = vpow2.f32 %v487_v24  ;;  %v473_v3 = vsub.f32 0.0, %v333_v32  ;;  %v335_v12 = vand.u32 2147483647, %v1190_v58  ;;  %v1201_v17 = vadd.f32 %v282_v19, %v1125_v42 }
 0x228   :  { %v377_v37 = vmul.f32 1.0614054, %v1169_v33  ;;  %901 = vrcp.f32 %v353_v49  ;;  %v344_v6 = vmul.f32 0.3275911, %v334_v61  ;;  %v474_v16 = vsub.f32 0.0, %v334_v61 }
 0x229   :  { %v1182_v50 = vpop.eup %891  ;;  %903 = vpow2.f32 %v489_v43  ;;  %v345_v22 = vmul.f32 0.3275911, %v335_v12  ;;  %v497_v26 = vmul.f32 1.442695, %v482_v2  ;;  %v1206_v27 = vmul.f32 0.5, %v1147_v7 }
 0x22a   :  { %v387_v47 = vadd.f32 -1.4531521, %v377_v37  ;;  %v379_v53 = vmul.f32 1.0614054, %v1182_v50  ;;  %905 = vpow2.f32 %v491_v51  ;;  %v1198_v4 = vpop.eup %893  ;;  %v354_v15 = vadd.f32 1.0, %v344_v6 }
 0x22b   :  { %907 = vrcp.f32 %v350_v57  ;;  %v483_v28 = vmul.f32 %v473_v3, %v333_v32  ;;  %v355_v19 = vadd.f32 1.0, %v345_v22  ;;  %v484_v37 = vmul.f32 %v474_v16, %v334_v61 }
 0x22c   :  { %v397_v41 = vmul.f32 %v1169_v33, %v387_v47  ;;  %v389_v63 = vadd.f32 -1.4531521, %v379_v53  ;;  %909 = vpow2.f32 %v493_v59  ;;  %v475_v38 = vsub.f32 0.0, %v335_v12 }
 0x22d   :  { %911 = vpow2.f32 %v495_v1  ;;  %v1215_v39 = vmul.f32 0.70710677, %v1201_v17  ;;  %vm311_vm3 = vcmp.ge.f32.partialorder %v1150_v10, 0.0  ;;  %v499_v48 = vmul.f32 1.442695, %v483_v28 }
 0x22e   :  { %v407_v62 = vadd.f32 1.4214138, %v397_v41  ;;  %v399_v9 = vmul.f32 %v1182_v50, %v389_v63  ;;  %913 = vrcp.f32 %v354_v15  ;;  %v501_v61 = vmul.f32 1.442695, %v484_v37 }
 0x22f   :  { %v1203_v25 = vpop.eup %895  ;;  %915 = vrcp.f32 %v355_v19  ;;  %v1228_v63 = vand.u32 2147483647, %v1215_v39  ;;  %vm312_vm4 = vcmp.ge.f32.partialorder %v1155_v13, 0.0  ;;  %vm313_vm5 = vcmp.ge.f32.partialorder %v1159_v18, 0.0 }
 0x230   :  { %v417_v8 = vmul.f32 %v1169_v33, %v407_v62  ;;  %v409_v24 = vadd.f32 1.4214138, %v399_v9  ;;  %v1208_v29 = vpop.eup %897  ;;  %v381_v42 = vmul.f32 1.0614054, %v1203_v25  ;;  %917 = vpow2.f32 %v497_v26 }
 0x231   :  { %v900_v34 = vpop.eup %899  ;;  %v382_v35 = vmul.f32 1.0614054, %v1208_v29  ;;  %v485_v62 = vmul.f32 %v475_v38, %v335_v12  ;;  %v1237_v9 = vsel %vm311_vm3, 1.0, %v935_v20  ;;  %919 = vpow2.f32 %v499_v48 }
 0x232   :  { %v427_v23 = vadd.f32 -0.28449672, %v417_v8  ;;  %v419_v31 = vmul.f32 %v1182_v50, %v409_v24  ;;  %v391_v43 = vadd.f32 -1.4531521, %v381_v42  ;;  %v1217_v45 = vpop.eup %901  ;;  %v346_v12 = vmul.f32 0.3275911, %v1228_v63 }
 0x233   :  { %v392_v47 = vadd.f32 -1.4531521, %v382_v35  ;;  %v1220_v49 = vpop.eup %903  ;;  %v383_v53 = vmul.f32 1.0614054, %v1217_v45  ;;  %921 = vpow2.f32 %v501_v61  ;;  %v1246_v10 = vmul.f32 1.442695, %v485_v62 }
 0x234   :  { %v437_v30 = vmul.f32 %v1169_v33, %v427_v23  ;;  %v429_v32 = vadd.f32 -0.28449672, %v419_v31  ;;  %v401_v41 = vmul.f32 %v1203_v25, %v391_v43  ;;  %v906_v57 = vpop.eup %905  ;;  %v356_v31 = vadd.f32 1.0, %v346_v12 }
 0x235   :  { %v402_v59 = vmul.f32 %v1208_v29, %v392_v47  ;;  %v1230_v1 = vpop.eup %907  ;;  %v378_v38 = vmul.f32 1.0614054, %v1198_v4  ;;  %vm314_vm6 = vcmp.ge.f32.partialorder %v1185_v55, 0.0  ;;  %vm310_vm8 = vcmp.ge.f32.partialorder %v1140_v0, 0.0 }
 0x236   :  { %v447_v7 = vadd.f32 0.2548296, %v437_v30  ;;  %v439_v54 = vmul.f32 %v1182_v50, %v429_v32  ;;  %v411_v6 = vadd.f32 1.4214138, %v401_v41  ;;  %v1232_v8 = vpop.eup %909  ;;  %923 = vrcp.f32 %v356_v31 }
 0x237   :  { %v412_v15 = vadd.f32 1.4214138, %v402_v59  ;;  %v912_v16 = vpop.eup %911  ;;  %925 = vpow2.f32 %v1246_v10  ;;  %v324_v10 = vsel %vm314_vm6, 1.0, %v935_v20  ;;  %v290_v52 = vmul.f32 0.5, %v1136_v56 }
 0x238   :  { %v457_v51 = vmul.f32 %v1169_v33, %v447_v7  ;;  %v449_v3 = vadd.f32 0.2548296, %v439_v54  ;;  %v393_v33 = vadd.f32 -1.4531521, %v383_v53  ;;  %v421_v22 = vmul.f32 %v1203_v25, %v411_v6  ;;  %v1243_v28 = vpop.eup %913 }
 0x239   :  { %v422_v30 = vmul.f32 %v1208_v29, %v412_v15  ;;  %v1251_v7 = vpop.eup %915  ;;  %v476_v53 = vsub.f32 0.0, %v1228_v63  ;;  %vm316_vm9 = vcmp.ge.f32.partialorder %v1215_v39, 0.0  ;;  %vm315_vm10 = vcmp.ge.f32.partialorder %v1190_v58, 0.0 }
 0x23a   :  { %v507_v2 = vmul.f32 %v900_v34, %v457_v51  ;;  %v459_v24 = vmul.f32 %v1182_v50, %v449_v3  ;;  %v403_v26 = vmul.f32 %v1217_v45, %v393_v33  ;;  %v431_v34 = vadd.f32 -0.28449672, %v421_v22  ;;  %v918_v51 = vpop.eup %917 }
 0x23b   :  { %v432_v37 = vadd.f32 -0.28449672, %v422_v30  ;;  %v384_v50 = vmul.f32 1.0614054, %v1243_v28  ;;  %v385_v41 = vmul.f32 1.0614054, %v1251_v7 }
 0x23c   :  { %v517_v23 = vsub.f32 1.0, %v507_v2  ;;  %v509_v19 = vmul.f32 %v906_v57, %v459_v24  ;;  %v413_v35 = vadd.f32 1.4214138, %v403_v26  ;;  %v441_v47 = vmul.f32 %v1203_v25, %v431_v34 }
 0x23d   :  { %v394_v54 = vadd.f32 -1.4531521, %v384_v50  ;;  %v395_v6 = vadd.f32 -1.4531521, %v385_v41  ;;  %v380_v33 = vmul.f32 1.0614054, %v1230_v1  ;;  %v486_v50 = vmul.f32 %v476_v53, %v1228_v63 }
 0x23e   :  { %v527_v42 = vmul.f32 %v517_v23, %v1163_v14  ;;  %v519_v43 = vsub.f32 1.0, %v509_v19  ;;  %v423_v48 = vmul.f32 %v1217_v45, %v413_v35  ;;  %v442_v14 = vmul.f32 %v1208_v29, %v432_v37 }
 0x23f   :  { %v451_v61 = vadd.f32 0.2548296, %v441_v47  ;;  %v404_v3 = vmul.f32 %v1243_v28, %v394_v54  ;;  %v388_v24 = vadd.f32 -1.4531521, %v378_v38  ;;  %v405_v26 = vmul.f32 %v1251_v7, %v395_v6 }
 0x240   :  { %v537_v32 = vadd.f32 1.0, %v527_v42  ;;  %v529_v59 = vmul.f32 %v519_v43, %v1180_v44  ;;  %v433_v62 = vadd.f32 -0.28449672, %v423_v48  ;;  %v452_v2 = vadd.f32 0.2548296, %v442_v14 }
 0x241   :  { %v461_v12 = vmul.f32 %v1203_v25, %v451_v61  ;;  %v414_v44 = vadd.f32 1.4214138, %v404_v3  ;;  %v390_v30 = vadd.f32 -1.4531521, %v380_v33  ;;  %v398_v34 = vmul.f32 %v1198_v4, %v388_v24 }
 0x242   :  { %v1260_v57 = vmul.f32 %v537_v32, %v1152_v11  ;;  %v539_v15 = vadd.f32 1.0, %v529_v59  ;;  %v443_v23 = vmul.f32 %v1217_v45, %v433_v62  ;;  %v920_v11 = vpop.eup %919  ;;  %v462_v22 = vmul.f32 %v1208_v29, %v452_v2 }
 0x243   :  { %v511_v42 = vmul.f32 %v912_v16, %v461_v12  ;;  %v922_v35 = vpop.eup %921  ;;  %v424_v25 = vmul.f32 %v1243_v28, %v414_v44  ;;  %v415_v37 = vadd.f32 1.4214138, %v405_v26  ;;  %v400_v38 = vmul.f32 %v1230_v1, %v390_v30 }
 0x244   :  { %v1271_v31 = vmul.f32 %v539_v15, %v1165_v21  ;;  %v453_v19 = vadd.f32 0.2548296, %v443_v23  ;;  %v408_v43 = vadd.f32 1.4214138, %v398_v34  ;;  %v1280_v47 = vpop.eup %923  ;;  %v512_v16 = vmul.f32 %v918_v51, %v462_v22 }
 0x245   :  { %v521_v29 = vsub.f32 1.0, %v511_v42  ;;  %v434_v48 = vadd.f32 -0.28449672, %v424_v25  ;;  %v425_v14 = vmul.f32 %v1251_v7, %v415_v37  ;;  %v410_v54 = vadd.f32 1.4214138, %v400_v38 }
 0x246   :  { %v463_v32 = vmul.f32 %v1217_v45, %v453_v19  ;;  %v557_v21 = vpack.c.bf16 %v1271_v31, %v1260_v57  ;;  %v386_v63 = vmul.f32 1.0614054, %v1280_v47  ;;  %v418_v53 = vmul.f32 %v1198_v4, %v408_v43  ;;  %v786_v57 = vld [vmem:[%s1372_s6] ss:$0 sm:$0xff] }
 0x247   :  { %v531_v41 = vmul.f32 %v521_v29, %v1237_v9  ;;  %v444_v45 = vmul.f32 %v1243_v28, %v434_v48  ;;  %v435_v61 = vadd.f32 -0.28449672, %v425_v14  ;;  %v505_v62 = vmul.f32 1.442695, %v486_v50 }
 0x248   :  { %v513_v59 = vmul.f32 %v920_v11, %v463_v32  ;;  %v420_v2 = vmul.f32 %v1230_v1, %v410_v54  ;;  %v322_v51 = vsel %vm312_vm4, 1.0, %v935_v20  ;;  %v396_v6 = vadd.f32 -1.4531521, %v386_v63 }
 0x249   :  { %v428_v33 = vadd.f32 -0.28449672, %v418_v53  ;;  %v522_v15 = vsub.f32 1.0, %v512_v16  ;;  %v323_v9 = vsel %vm313_vm5, 1.0, %v935_v20  ;;  %v454_v12 = vadd.f32 0.2548296, %v444_v45 }
 0x24a   :  { %v523_v3 = vsub.f32 1.0, %v513_v59  ;;  %v430_v23 = vadd.f32 -0.28449672, %v420_v2  ;;  %v541_v24 = vadd.f32 1.0, %v531_v41  ;;  %v406_v22 = vmul.f32 %v1280_v47, %v396_v6 }
 0x24b   :  { %v438_v44 = vmul.f32 %v1198_v4, %v428_v33  ;;  %v464_v13 = vmul.f32 %v1243_v28, %v454_v12  ;;  %v445_v18 = vmul.f32 %v1251_v7, %v435_v61  ;;  %v532_v34 = vmul.f32 %v522_v15, %v322_v51 }
 0x24c   :  { %v533_v11 = vmul.f32 %v523_v3, %v323_v9  ;;  %v440_v26 = vmul.f32 %v1230_v1, %v430_v23  ;;  %v416_v42 = vadd.f32 1.4214138, %v406_v22  ;;  %927 = vpow2.f32 %v505_v62 }
 0x24d   :  { %v448_v19 = vadd.f32 0.2548296, %v438_v44  ;;  %v514_v25 = vmul.f32 %v922_v35, %v464_v13  ;;  %v551_v50 = vmul.f32 %v541_v24, %v1192_v60  ;;  %v455_v35 = vadd.f32 0.2548296, %v445_v18 }
 0x24e   :  { %v543_v30 = vadd.f32 1.0, %v533_v11  ;;  %v450_v37 = vadd.f32 0.2548296, %v440_v26  ;;  %v426_v29 = vmul.f32 %v1280_v47, %v416_v42  ;;  %v292_v54 = vmul.f32 0.5, %v1144_v5 }
 0x24f   :  { %v458_v28 = vmul.f32 %v1198_v4, %v448_v19  ;;  %v524_v32 = vsub.f32 1.0, %v514_v25  ;;  %v294_v59 = vmul.f32 0.5, %v1172_v36  ;;  %v465_v53 = vmul.f32 %v1251_v7, %v455_v35 }
 0x250   :  { %v553_v38 = vmul.f32 %v543_v30, %v1206_v27  ;;  %v460_v43 = vmul.f32 %v1230_v1, %v450_v37  ;;  %v436_v16 = vadd.f32 -0.28449672, %v426_v29  ;;  %v542_v27 = vadd.f32 1.0, %v532_v34  ;;  %v930_v29 = vld [vmem:[%s1366_s0 + $0x8] sm:$0xff] }
 0x251   :  { %v508_v48 = vmul.f32 %v1220_v49, %v458_v28  ;;  %v534_v14 = vmul.f32 %v524_v32, %v324_v10  ;;  %v318_v1 = vsel %vm308_vm7, 1.0, %v935_v20  ;;  %v320_v45 = vsel %vm310_vm8, 1.0, %v935_v20 }
 0x252   :  { %v559_v60 = vpack.c.bf16 %v553_v38, %v551_v50  ;;  %v510_v4 = vmul.f32 %v1232_v8, %v460_v43  ;;  %v446_v41 = vmul.f32 %v1280_v47, %v436_v16  ;;  %v926_v8 = vpop.eup %925  ;;  %v552_v62 = vmul.f32 %v542_v27, %v292_v54  ;;  %v931_v27 = vld [vmem:[%s1366_s0 + $0x10] sm:$0xff]  ;;  %v932_v54 = vld [vmem:[%s1366_s0 + $0x18] sm:$0xff] }
 0x253   :  { %v518_v55 = vsub.f32 1.0, %v508_v48  ;;  %v544_v63 = vadd.f32 1.0, %v534_v14  ;;  %v288_v6 = vmul.f32 0.5, %v1129_v46  ;;  %v515_v9 = vmul.f32 %v926_v8, %v465_v53 }
 0x254   :  { %v520_v49 = vsub.f32 1.0, %v510_v4  ;;  %v456_v0 = vadd.f32 0.2548296, %v446_v41  ;;  %v326_v11 = vsel %vm316_vm9, 1.0, %v935_v20  ;;  %v296_v46 = vmul.f32 0.5, %v1201_v17 }
 0x255   :  { %v528_v61 = vmul.f32 %v518_v55, %v318_v1  ;;  %v554_v5 = vmul.f32 %v544_v63, %v294_v59  ;;  %v325_v39 = vsel %vm315_vm10, 1.0, %v935_v20  ;;  %v295_v42 = vmul.f32 0.5, %v1176_v40  ;;  %v929_v40 = vld [vmem:[%s1366_s0] sm:$0xff] }
 0x256   :  { %v530_v2 = vmul.f32 %v520_v49, %v320_v45  ;;  %v466_v51 = vmul.f32 %v1280_v47, %v456_v0  ;;  %v928_v36 = vpop.eup %927  ;;  %v525_v47 = vsub.f32 1.0, %v515_v9  ;;  %v933_v0 = vld [vmem:[%s1366_s0 + $0x20] sm:$0x3] }
 0x257   :  { %v538_v3 = vadd.f32 1.0, %v528_v61  ;;  %v560_v15 = vpack.c.bf16 %v554_v5, %v552_v62 }
 0x258   :  { %v540_v33 = vadd.f32 1.0, %v530_v2  ;;  %v516_v7 = vmul.f32 %v928_v36, %v466_v51  ;;  %v535_v13 = vmul.f32 %v525_v47, %v325_v39 }
 0x259   :  { %v548_v12 = vmul.f32 %v538_v3, %v288_v6 }
 0x25a   :  { %v550_v23 = vmul.f32 %v540_v33, %v290_v52  ;;  %v526_v24 = vsub.f32 1.0, %v516_v7  ;;  %v545_v18 = vadd.f32 1.0, %v535_v13 }
 0x25c   :  { %v558_v22 = vpack.c.bf16 %v550_v23, %v548_v12  ;;  %v536_v44 = vmul.f32 %v526_v24, %v326_v11  ;;  %v555_v58 = vmul.f32 %v545_v18, %v295_v42 }
 0x25e   :  { %730 = vmatprep.mubr.bf16.mxu1 %v558_v22  ;;  %v546_v56 = vadd.f32 1.0, %v536_v44  ;;  %v561_v19 = vpack.c.bf16 %v555_v58, %v555_v58 }
 0x25f   :  { %731 = vmatmul.mubr.bf16.vlgmr.msra.gmra.mrb[0].mxu1 %v557_v21 }
 0x260   :  { %738 = vmatprep.mubr.bf16.mxu1 %v560_v15  ;;  %v556_v26 = vmul.f32 %v546_v56, %v296_v46 }
 0x262   :  { %v562_v30 = vpack.c.bf16 %v556_v26, %v556_v26 }
 0x267   :  { %739 = vmatmul.mubr.bf16.gmra.mrb[4].mxu1 %v559_v60 }
 0x268   :  { %746 = vmatprep.mubr.bf16.mxu1 %v562_v30 }
 0x26f   :  { %747 = vmatmul.mubr.bf16.gmra.mrb[8].mxu1 %v561_v19 }
 0x332   :  { %v819_v17 = vpop.f32.mrb[0].mxu1 }
 0x333   :  { %v820_v31 = vpop.f32.mrb[1].mxu1 }
 0x334   :  { %v821_v21 = vadd.f32 %v820_v31, %v819_v17  ;;  %v822_v20 = vpop.f32.mrb[2].mxu1 }
 0x335   :  { %v823_v34 = vpop.f32.mrb[3].mxu1 }
 0x336   :  { %v733_v25 = vadd.f32 %v821_v21, %v786_v57  ;;  %v824_v37 = vadd.f32 %v823_v34, %v822_v20 }
 0x338   :  { %v754_v50 = vadd.f32 %v929_v40, %v733_v25  ;;  %v736_v38 = vadd.f32 %v824_v37, %v786_v57 }
 0x33a   :  { %759 = vst [vmem:[%s1373_s7] sm:$0xff] %v754_v50  ;;  %v755_v28 = vadd.f32 %v930_v29, %v736_v38  ;;  %v825_v10 = vpop.f32.mrb[4].mxu1 }
 0x33b   :  { %v826_v32 = vpop.f32.mrb[5].mxu1 }
 0x33c   :  { %760 = vst [vmem:[%s1373_s7 + $0x8] sm:$0xff] %v755_v28  ;;  %v827_v43 = vadd.f32 %v826_v32, %v825_v10  ;;  %v828_v35 = vpop.f32.mrb[6].mxu1 }
 0x33d   :  { %v829_v16 = vpop.f32.mrb[7].mxu1 }
 0x33e   :  { %v741_v48 = vadd.f32 %v827_v43, %v786_v57  ;;  %v830_v60 = vadd.f32 %v829_v16, %v828_v35 }
 0x340   :  { %v756_v14 = vadd.f32 %v931_v27, %v741_v48  ;;  %v744_v4 = vadd.f32 %v830_v60, %v786_v57 }
 0x342   :  { %761 = vst [vmem:[%s1373_s7 + $0x10] sm:$0xff] %v756_v14  ;;  %v757_v41 = vadd.f32 %v932_v54, %v744_v4  ;;  %v831_v55 = vpop.f32.mrb[8].mxu1 }
 0x343   :  { %v832_v59 = vpop.f32.mrb[9].mxu1 }
 0x344   :  { %762 = vst [vmem:[%s1373_s7 + $0x18] sm:$0xff] %v757_v41  ;;  %v833_v63 = vadd.f32 %v832_v59, %v831_v55  ;;  %v834_v1 = vpop.f32.mrb[10].mxu1 }
 0x345   :  { %v835_v49 = vpop.f32.mrb[11].mxu1 }
 0x346   :  { %v749_v53 = vadd.f32 %v833_v63, %v786_v57 }
 0x348   :  { %v758_v45 = vadd.f32 %v933_v0, %v749_v53 }
 0x34a   :  { %763 = vst [vmem:[%s1373_s7 + $0x20] sm:$0x3] %v758_v45 }

</bundles_post_ra>
